<compile_context>
chip_gen: v6e
topology: v6e:2x2x1
jax: 0.10.0
libtpu: 0.0.40
codegen_flags: <defaults>
</compile_context>

<pallas_src>
import functools
import math

import jax
import jax.numpy as jnp
from jax.experimental import pallas as pl
from jax.experimental.pallas import tpu as pltpu

_EPS = 1e-5
_EXPANSION = 4
_VMEM_LIMIT = 48 * 1024 * 1024  # <= v7x's 64 MiB physical VMEM


def _round_up(x, m):
    return (x + m - 1) // m * m


def _pick_div(dim, candidates):
    for c in candidates:
        if dim % c == 0:
            return c
    return None


# ---------------------------------------------------------------------------
# Tiled fused matmul kernel:  out = act(x @ w + bias [+ residual])
# ---------------------------------------------------------------------------
def _mm_kernel(x_ref, w_ref, b_ref, o_ref, acc_ref, *, relu):
    @pl.when(pl.program_id(2) == 0)
    def _():
        acc_ref[...] = jnp.zeros_like(acc_ref)

    acc_ref[...] += jnp.dot(x_ref[...], w_ref[...],
                            preferred_element_type=jnp.float32)

    @pl.when(pl.program_id(2) == pl.num_programs(2) - 1)
    def _():
        out = acc_ref[...] + b_ref[...]
        if relu:
            out = jnp.maximum(out, 0.0)
        o_ref[...] = out.astype(o_ref.dtype)


def _mm_res_kernel(x_ref, w_ref, b_ref, r_ref, o_ref, acc_ref, *, relu):
    @pl.when(pl.program_id(2) == 0)
    def _():
        acc_ref[...] = jnp.zeros_like(acc_ref)

    acc_ref[...] += jnp.dot(x_ref[...], w_ref[...],
                            preferred_element_type=jnp.float32)

    @pl.when(pl.program_id(2) == pl.num_programs(2) - 1)
    def _():
        out = acc_ref[...] + b_ref[...] + r_ref[...].astype(jnp.float32)
        if relu:
            out = jnp.maximum(out, 0.0)
        o_ref[...] = out.astype(o_ref.dtype)


def _tile_m(m):
    if m <= 512:
        return m  # full-extent block, always legal
    return _pick_div(m, (512, 256, 128, 64, 32, 16, 8))


def _tile_n(n):
    if n <= 256:
        return n
    return _pick_div(n, (256, 128))


def _tile_k(k):
    if k <= 512:
        return k
    t = _pick_div(k, (512, 256, 128))
    return t if t is not None else k


def fused_matmul(x, w, bias, residual=None, relu=False):
    """act((x @ w) + bias [+ residual]).  x:(M,K) bf16, w:(K,N) bf16, bias:(1,N) f32."""
    m, k = x.shape
    n = w.shape[1]

    tm = _tile_m(m)
    if tm is None:  # ragged M fallback (never hit at these shapes)
        mp = _round_up(m, 256)
        x = jnp.pad(x, ((0, mp - m), (0, 0)))
        if residual is not None:
            residual = jnp.pad(residual, ((0, mp - m), (0, 0)))
        tm = 256
    else:
        mp = m

    tn = _tile_n(n)
    if tn is None:  # ragged N fallback (never hit at these shapes)
        np_ = _round_up(n, 128)
        w = jnp.pad(w, ((0, 0), (0, np_ - n)))
        bias = jnp.pad(bias, ((0, 0), (0, np_ - n)))
        if residual is not None:
            residual = jnp.pad(residual, ((0, 0), (0, np_ - n)))
        tn = 128
    else:
        np_ = n

    tk = _tile_k(k)
    grid = (mp // tm, np_ // tn, k // tk)

    in_specs = [
        pl.BlockSpec((tm, tk), lambda i, j, kk: (i, kk)),
        pl.BlockSpec((tk, tn), lambda i, j, kk: (kk, j)),
        pl.BlockSpec((1, tn), lambda i, j, kk: (0, j)),
    ]
    args = [x, w, bias]
    if residual is None:
        kernel = functools.partial(_mm_kernel, relu=relu)
    else:
        in_specs.append(pl.BlockSpec((tm, tn), lambda i, j, kk: (i, j)))
        args.append(residual)
        kernel = functools.partial(_mm_res_kernel, relu=relu)

    bytes_accessed = int(x.size * x.dtype.itemsize + w.size * w.dtype.itemsize
                         + bias.size * bias.dtype.itemsize + mp * np_ * 2)
    if residual is not None:
        bytes_accessed += int(residual.size * residual.dtype.itemsize)

    out = pl.pallas_call(
        kernel,
        out_shape=jax.ShapeDtypeStruct((mp, np_), jnp.bfloat16),
        grid=grid,
        in_specs=in_specs,
        out_specs=pl.BlockSpec((tm, tn), lambda i, j, kk: (i, j)),
        scratch_shapes=[pltpu.VMEM((tm, tn), jnp.float32)],
        compiler_params=pltpu.CompilerParams(
            dimension_semantics=("parallel", "parallel", "arbitrary"),
            vmem_limit_bytes=_VMEM_LIMIT),
        cost_estimate=pl.CostEstimate(flops=2 * mp * np_ * k,
                                      transcendentals=0,
                                      bytes_accessed=bytes_accessed),
    )(*args)
    if mp != m or np_ != n:
        out = out[:m, :n]
    return out


# ---------------------------------------------------------------------------
# Direct 3x3 stride-1 conv kernel (no im2col in HBM).
# The padded activation stays in HBM (pl.ANY); each grid step DMAs a contiguous
# row window into VMEM and accumulates the 9 taps as contiguous-slab matmuls in
# "padded width" coordinates (the 2 garbage columns per row are sliced off in
# the wrapper).
# ---------------------------------------------------------------------------
def _conv3x3_kernel(x_hbm, w_ref, b_ref, o_ref, buf, sem, *, toh, wp, relu):
    ni = pl.program_id(0)
    i = pl.program_id(1)
    rows = buf.shape[0]
    start = i * (toh * wp)
    cp = pltpu.make_async_copy(x_hbm.at[ni, pl.ds(start, rows)], buf, sem)
    cp.start()
    cp.wait()

    cout = o_ref.shape[1]
    m = toh * wp
    acc = jnp.zeros((m, cout), jnp.float32)
    for ky in range(3):
        for kx in range(3):
            lhs = buf[pl.ds(ky * wp + kx, m), :]
            acc = acc + jnp.dot(lhs, w_ref[ky, kx],
                                preferred_element_type=jnp.float32)
    out = acc + b_ref[...]
    if relu:
        out = jnp.maximum(out, 0.0)
    o_ref[...] = out.astype(o_ref.dtype)


def conv3x3_s1(x4, w, bias, relu=True):
    """3x3 / stride 1 / pad 1 conv + bias (+ReLU).  x4:(N,H,W,Cin) bf16.
    Returns 2-D (N*H*W, Cout) bf16, or None if this path is not applicable."""
    n, h, wdt, cin = x4.shape
    cout = w.shape[3]
    oh, ow = h, wdt
    wp_ = wdt + 2

    toh = None
    for c in (16, 8, 4, 2, 1):
        if oh % c == 0 and (c * wp_) % 8 == 0:
            toh = c
            break
    if toh is None:
        return None

    xp = jnp.pad(x4, ((0, 0), (1, 1), (1, 1), (0, 0)))          # (n, h+2, wp_, cin)
    xflat = jnp.pad(xp.reshape(n, (h + 2) * wp_, cin),
                    ((0, 0), (0, 2), (0, 0)))                    # over-read guard rows
    bpi = oh // toh
    buf_rows = (toh + 2) * wp_ + 2

    out_pw = pl.pallas_call(
        functools.partial(_conv3x3_kernel, toh=toh, wp=wp_, relu=relu),
        out_shape=jax.ShapeDtypeStruct((n * oh * wp_, cout), jnp.bfloat16),
        grid=(n, bpi),
        in_specs=[
            pl.BlockSpec(memory_space=pl.ANY),
            pl.BlockSpec((3, 3, cin, cout), lambda ni, i: (0, 0, 0, 0)),
            pl.BlockSpec((1, cout), lambda ni, i: (0, 0)),
        ],
        out_specs=pl.BlockSpec((toh * wp_, cout),
                               lambda ni, i: (ni * bpi + i, 0)),
        scratch_shapes=[pltpu.VMEM((buf_rows, cin), jnp.bfloat16),
                        pltpu.SemaphoreType.DMA],
        compiler_params=pltpu.CompilerParams(
            dimension_semantics=("parallel", "parallel"),
            vmem_limit_bytes=_VMEM_LIMIT),
    )(xflat, w, bias)

    out = out_pw.reshape(n, oh, wp_, cout)[:, :, :ow, :]
    return out.reshape(n * oh * ow, cout)


# ---------------------------------------------------------------------------
# im2col fallback (only for the 4 stride-2 3x3 convs: stem conv1a + first block
# of layers 2-4); done in bf16 at reduced spatial resolution.
# ---------------------------------------------------------------------------
def _im2col(x4, kh, kw, stride, padding):
    n, h, w, c = x4.shape
    oh = (h + 2 * padding - kh) // stride + 1
    ow = (w + 2 * padding - kw) // stride + 1
    xp = jnp.pad(x4, ((0, 0), (padding, padding), (padding, padding), (0, 0)))
    cols = []
    for ky in range(kh):
        for kx in range(kw):
            patch = jax.lax.slice(
                xp, (0, ky, kx, 0),
                (n, ky + (oh - 1) * stride + 1, kx + (ow - 1) * stride + 1, c),
                (1, stride, stride, 1))
            cols.append(patch)
    patches = jnp.concatenate(cols, axis=-1).reshape(n * oh * ow, kh * kw * c)
    return patches, (n, oh, ow)


# ---------------------------------------------------------------------------
# Convolution dispatcher (activations flow as 2-D (N*H*W, C) bf16 arrays)
# ---------------------------------------------------------------------------
def conv_bn(x2d, shape_nhw, w, bias, kh, kw, stride=1, relu=False, residual=None):
    n, h, wdt = shape_nhw
    cin = x2d.shape[1]
    cout = w.shape[-1]

    if kh == 1:  # 1x1 conv -> pure tiled matmul (strided subsample if needed)
        if stride == 1:
            patches, oh, ow = x2d, h, wdt
        else:
            x4 = x2d.reshape(n, h, wdt, cin)[:, ::stride, ::stride, :]
            oh, ow = x4.shape[1], x4.shape[2]
            patches = x4.reshape(n * oh * ow, cin)
        out = fused_matmul(patches, w.reshape(cin, cout), bias,
                           residual=residual, relu=relu)
        return out, (n, oh, ow)

    # 3x3 conv
    x4 = x2d.reshape(n, h, wdt, cin)
    if stride == 1 and residual is None:
        direct = conv3x3_s1(x4, w, bias, relu=relu)
        if direct is not None:
            return direct, (n, h, wdt)
    patches, (n2, oh, ow) = _im2col(x4, kh, kw, stride, 1)
    out = fused_matmul(patches, w.reshape(kh * kw * cin, cout), bias,
                       residual=residual, relu=relu)
    return out, (n2, oh, ow)


# ---------------------------------------------------------------------------
# MaxPool 3x3 / stride 2 / pad 1 via a single Pallas kernel over a phase-split
# view of the padded input (no (9, M, C) stacked tensor).
# ---------------------------------------------------------------------------
def _maxpool_kernel(p_ref, o_ref, *, oh, ow):
    res = None
    for ky in range(3):
        a, ri = ky & 1, ky >> 1
        for kx in range(3):
            b, ci = kx & 1, kx >> 1
            v = p_ref[2 * a + b, 0, pl.ds(ri, oh), pl.ds(ci, ow), :]
            res = v if res is None else jnp.maximum(res, v)
    o_ref[0] = res


def maxpool_3x3_s2_p1(x2d, shape_nhw):
    n, h, w = shape_nhw
    c = x2d.shape[1]
    x4 = x2d.reshape(n, h, w, c)
    oh = (h - 1) // 2 + 1
    ow = (w - 1) // 2 + 1
    hp, wp = 2 * (oh + 1), 2 * (ow + 1)
    xp = jnp.pad(x4, ((0, 0), (1, hp - h - 1), (1, wp - w - 1), (0, 0)),
                 constant_values=-1e30)
    a_sz, b_sz = oh + 1, ow + 1
    # (N,Hp,Wp,C) -> (N,A,2,B,2,C) -> (4,N,A,B,C) with phase index = 2*a + b
    ph = xp.reshape(n, a_sz, 2, b_sz, 2, c).transpose(2, 4, 0, 1, 3, 5)
    ph = ph.reshape(4, n, a_sz, b_sz, c)

    out = pl.pallas_call(
        functools.partial(_maxpool_kernel, oh=oh, ow=ow),
        out_shape=jax.ShapeDtypeStruct((n, oh, ow, c), x2d.dtype),
        grid=(n,),
        in_specs=[pl.BlockSpec((4, 1, a_sz, b_sz, c),
                               lambda i: (0, i, 0, 0, 0))],
        out_specs=pl.BlockSpec((1, oh, ow, c), lambda i: (i, 0, 0, 0)),
        compiler_params=pltpu.CompilerParams(
            dimension_semantics=("parallel",),
            vmem_limit_bytes=_VMEM_LIMIT),
    )(ph)
    return out.reshape(n * oh * ow, c), (n, oh, ow)


# ---------------------------------------------------------------------------
# Deterministic parameters (matches the reference __init__ init; eval-mode BN
# folded into the weights: scale = 1/sqrt(1+eps), bias = 0).
# ---------------------------------------------------------------------------
def _conv_weight(key, kh, kw, cin, cout):
    fan = kh * kw * cout
    return math.sqrt(2.0 / fan) * jax.random.normal(key, (kh, kw, cin, cout),
                                                    jnp.float32)


def _bn_init(c):
    return (jnp.ones((c,), jnp.float32), jnp.zeros((c,), jnp.float32),
            jnp.zeros((c,), jnp.float32), jnp.ones((c,), jnp.float32))


def _fold_bn(w, gamma, beta, mean, var):
    scale = gamma / jnp.sqrt(var + _EPS)
    w_f = (w * scale).astype(jnp.bfloat16)                 # fold scale over Cout
    bias = (beta - mean * scale).reshape(1, -1).astype(jnp.float32)
    return w_f, bias


def _make_bottleneck(key, inplanes, planes, stride=1, downsample=False):
    k = jax.random.split(key, 4)
    w1, b1 = _fold_bn(_conv_weight(k[0], 1, 1, inplanes, planes), *_bn_init(planes))
    w2, b2 = _fold_bn(_conv_weight(k[1], 3, 3, planes, planes), *_bn_init(planes))
    w3, b3 = _fold_bn(_conv_weight(k[2], 1, 1, planes, planes * _EXPANSION),
                      *_bn_init(planes * _EXPANSION))
    p = {'w1': w1, 'b1': b1, 'w2': w2, 'b2': b2, 'w3': w3, 'b3': b3,
         'stride': stride}
    if downsample:
        wd, bd = _fold_bn(_conv_weight(k[3], 1, 1, inplanes, planes * _EXPANSION),
                          *_bn_init(planes * _EXPANSION))
        p['wd'], p['bd'] = wd, bd
    return p


def make_resnet_params(key, layers=(1, 1, 1, 1)):
    keys = jax.random.split(key, 3 + sum(layers))
    params = {}
    params['w1a'], params['b1a'] = _fold_bn(_conv_weight(keys[0], 3, 3, 3, 64), *_bn_init(64))
    params['w1b'], params['b1b'] = _fold_bn(_conv_weight(keys[1], 3, 3, 64, 64), *_bn_init(64))
    params['w1c'], params['b1c'] = _fold_bn(_conv_weight(keys[2], 3, 3, 64, 128), *_bn_init(128))
    inplanes = 128
    ki = 3
    layer_params = []
    for planes, nb, st in zip((64, 128, 256, 512), layers, (1, 2, 2, 2)):
        blocks = []
        for bi in range(nb):
            stride = st if bi == 0 else 1
            downsample = (bi == 0) and (stride != 1 or inplanes != planes * _EXPANSION)
            blocks.append(_make_bottleneck(keys[ki], inplanes, planes,
                                           stride=stride, downsample=downsample))
            ki += 1
            inplanes = planes * _EXPANSION
        layer_params.append(blocks)
    params['layers'] = layer_params
    params['layer_counts'] = tuple(layers)
    return params


# ---------------------------------------------------------------------------
# Forward pass
# ---------------------------------------------------------------------------
def _bottleneck_forward(x2d, shape_nhw, p):
    out, shp = conv_bn(x2d, shape_nhw, p['w1'], p['b1'], 1, 1, stride=1, relu=True)
    out, shp = conv_bn(out, shp, p['w2'], p['b2'], 3, 3, stride=p['stride'], relu=True)
    if 'wd' in p:
        res, _ = conv_bn(x2d, shape_nhw, p['wd'], p['bd'], 1, 1,
                         stride=p['stride'], relu=False)
    else:
        res = x2d
    out, shp = conv_bn(out, shp, p['w3'], p['b3'], 1, 1, stride=1,
                       relu=True, residual=res)
    return out, shp


def resnet_forward(params, x_nchw):
    x = jnp.transpose(x_nchw, (0, 2, 3, 1)).astype(jnp.bfloat16)  # NCHW -> NHWC bf16
    n, h, w, c = x.shape
    x2d, shp = x.reshape(n * h * w, c), (n, h, w)

    # deep_base stem (conv/bn/relu x3; the 3rd conv's bn/relu are self.bn1/self.relu)
    x2d, shp = conv_bn(x2d, shp, params['w1a'], params['b1a'], 3, 3, stride=2, relu=True)
    x2d, shp = conv_bn(x2d, shp, params['w1b'], params['b1b'], 3, 3, stride=1, relu=True)
    x2d, shp = conv_bn(x2d, shp, params['w1c'], params['b1c'], 3, 3, stride=1, relu=True)
    x2d, shp = maxpool_3x3_s2_p1(x2d, shp)

    feats = []
    counts = params['layer_counts']
    for li, blocks in enumerate(params['layers']):
        if li >= 2 and (counts[2] == 0 or counts[3] == 0):
            break
        for p in blocks:
            x2d, shp = _bottleneck_forward(x2d, shp, p)
        n_, oh, ow = shp
        ch = x2d.shape[1]
        feats.append(jnp.transpose(x2d.reshape(n_, oh, ow, ch),
                                   (0, 3, 1, 2)).astype(jnp.float32))
    return feats


if __name__ == "__main__":
    key = jax.random.PRNGKey(0)
    pkey, xkey = jax.random.split(key)
    params = make_resnet_params(pkey, layers=(1, 1, 1, 1))
    x = jax.random.normal(xkey, (2, 3, 32, 32), jnp.float32)
    feats = resnet_forward(params, x)
    for f in feats:
        jax.block_until_ready(f)
    # feature shapes: (2,256,8,8) (2,512,4,4) (2,1024,2,2) (2,2048,1,1)
    print("KERNEL_OK")
</pallas_src>

<mosaic_0001>
module attributes {stable_mosaic.version = 11 : i64} {
  func.func @_mm_kernel(%arg0: i32, %arg1: i32, %arg2: i32, %arg3: memref<512x27xbf16, #tpu.memory_space<vmem>>, %arg4: memref<27x64xbf16, #tpu.memory_space<vmem>>, %arg5: memref<1x64xf32, #tpu.memory_space<vmem>>, %arg6: memref<512x64xbf16, #tpu.memory_space<vmem>>, %arg7: memref<512x64xf32, #tpu.memory_space<vmem>>) attributes {dimension_semantics = [#tpu.dimension_semantics<parallel>, #tpu.dimension_semantics<parallel>, #tpu.dimension_semantics<arbitrary>], iteration_bounds = array<i64: 1, 1, 1>, scalar_prefetch = 0 : i64, scratch_operands = 1 : i64, tpu.core_type = #tpu.core_type<tc>, window_params = [{transform_indices = @transform_0, window_bounds = array<i64: 512, 27>}, {transform_indices = @transform_1, window_bounds = array<i64: 27, 64>}, {transform_indices = @transform_2, window_bounds = array<i64: 1, 64>}, {transform_indices = @transform_3, window_bounds = array<i64: 512, 64>}]} {
    %c0_i32 = arith.constant 0 : i32
    %0 = arith.cmpi eq, %arg2, %c0_i32 : i32
    %1 = arith.extui %0 : i1 to i32
    %c0_i32_0 = arith.constant 0 : i32
    %2 = arith.cmpi ne, %1, %c0_i32_0 : i32
    scf.if %2 {
      %cst_10 = arith.constant 0.000000e+00 : f32
      %12 = vector.broadcast %cst_10 : f32 to vector<512x64xf32>
      %c0_11 = arith.constant 0 : index
      %c0_12 = arith.constant 0 : index
      %13 = vector.load %arg7[%c0_11, %c0_12] : memref<512x64xf32, #tpu.memory_space<vmem>>, vector<512x64xf32>
      tpu.vector_store %arg7[%c0_11, %c0_12], %12 {strides = array<i32>} : memref<512x64xf32, #tpu.memory_space<vmem>>, vector<512x64xf32>,
    } else {
    }
    %c0 = arith.constant 0 : index
    %c0_1 = arith.constant 0 : index
    %3 = vector.load %arg7[%c0, %c0_1] : memref<512x64xf32, #tpu.memory_space<vmem>>, vector<512x64xf32>
    %c0_2 = arith.constant 0 : index
    %c0_3 = arith.constant 0 : index
    %4 = vector.load %arg3[%c0_2, %c0_3] : memref<512x27xbf16, #tpu.memory_space<vmem>>, vector<512x27xbf16>
    %c0_4 = arith.constant 0 : index
    %c0_5 = arith.constant 0 : index
    %5 = vector.load %arg4[%c0_4, %c0_5] : memref<27x64xbf16, #tpu.memory_space<vmem>>, vector<27x64xbf16>
    %cst = arith.constant dense<0.000000e+00> : vector<512x64xf32>
    %6 = tpu.matmul %4, %5, %cst {dimension_numbers = #tpu.dot_dimension_numbers<[1], [0], [0], [1], [0, 0, 1, 1], [], []>} : vector<512x27xbf16>, vector<27x64xbf16>, vector<512x64xf32> -> vector<512x64xf32>
    %7 = arith.addf %3, %6 : vector<512x64xf32>
    %c0_6 = arith.constant 0 : index
    %c0_7 = arith.constant 0 : index
    %8 = vector.load %arg7[%c0_6, %c0_7] : memref<512x64xf32, #tpu.memory_space<vmem>>, vector<512x64xf32>
    tpu.vector_store %arg7[%c0_6, %c0_7], %7 {strides = array<i32>} : memref<512x64xf32, #tpu.memory_space<vmem>>, vector<512x64xf32>,
    %c0_i32_8 = arith.constant 0 : i32
    %9 = arith.cmpi eq, %arg2, %c0_i32_8 : i32
    %10 = arith.extui %9 : i1 to i32
    %c0_i32_9 = arith.constant 0 : i32
    %11 = arith.cmpi ne, %10, %c0_i32_9 : i32
    scf.if %11 {
      %c0_10 = arith.constant 0 : index
      %c0_11 = arith.constant 0 : index
      %12 = vector.load %arg7[%c0_10, %c0_11] : memref<512x64xf32, #tpu.memory_space<vmem>>, vector<512x64xf32>
      %c0_12 = arith.constant 0 : index
      %c0_13 = arith.constant 0 : index
      %13 = vector.load %arg5[%c0_12, %c0_13] : memref<1x64xf32, #tpu.memory_space<vmem>>, vector<1x64xf32>
      %14 = vector.broadcast %13 : vector<1x64xf32> to vector<512x64xf32>
      %15 = arith.addf %12, %14 : vector<512x64xf32>
      %cst_14 = arith.constant 0.000000e+00 : f32
      %16 = vector.broadcast %cst_14 : f32 to vector<512x64xf32>
      %17 = arith.maximumf %15, %16 : vector<512x64xf32>
      %18 = arith.truncf %17 : vector<512x64xf32> to vector<512x64xbf16>
      %c0_15 = arith.constant 0 : index
      %c0_16 = arith.constant 0 : index
      %19 = vector.load %arg6[%c0_15, %c0_16] : memref<512x64xbf16, #tpu.memory_space<vmem>>, vector<512x64xbf16>
      tpu.vector_store %arg6[%c0_15, %c0_16], %18 {strides = array<i32>} : memref<512x64xbf16, #tpu.memory_space<vmem>>, vector<512x64xbf16>,
    } else {
    }
    return
  }
  func.func @transform_0(%arg0: i32, %arg1: i32, %arg2: i32) -> (i32, i32) {
    %c0_i32 = arith.constant 0 : i32
    return %arg0, %arg2 : i32, i32
  }
  func.func @transform_1(%arg0: i32, %arg1: i32, %arg2: i32) -> (i32, i32) {
    %c0_i32 = arith.constant 0 : i32
    return %arg2, %arg1 : i32, i32
  }
  func.func @transform_2(%arg0: i32, %arg1: i32, %arg2: i32) -> (i32, i32) {
    %c0_i32 = arith.constant 0 : i32
    %c0_i32_0 = arith.constant 0 : i32
    return %c0_i32, %arg1 : i32, i32
  }
  func.func @transform_3(%arg0: i32, %arg1: i32, %arg2: i32) -> (i32, i32) {
    %c0_i32 = arith.constant 0 : i32
    return %arg0, %arg1 : i32, i32
  }
}

</mosaic_0001>

<bundles_post_ra>
// kernel: tpu_custom_call.1
= control target key start
LH: loop header
LB: loop body
LE: loop exit
PB: predicated region body
PF: predicated region fallthrough
CT: control target
= control target key end

     0   :  { %vm484_vm0 = vcmask 1044480   ;;  %vm485_vm1 = vcmask 1045504   ;;  %v1774_v1 = vmov 65535   ;;  %vm387_vm2 = vcmask 220160   ;;  %s2459_s1 = inlined_call_operand.vmem [shape: bf16[27,64], index: 1, kind: input, shape index: {}]   ;;  %s2460_s0 = inlined_call_operand.vmem [shape: bf16[512,27], index: 0, kind: input, shape index: {}]   ;;  %s2461_s2 = inlined_call_operand.vmem [shape: f32[1,64], index: 2, kind: input, shape index: {}]   ;;  %s2462_s3 = inlined_call_operand.vmem [shape: bf16[512,64], index: 3, kind: output, shape index: {}]  }
   0x1   :  { %v1739_v0 = vld [vmem:[%s2459_s1 + $0x8] sm:$0x3f]   ;;  %v486_v2 = vsel %vm484_vm0, 4294967295, %v1774_v1  ;;  %v1741_v4 = vld [vmem:[%s2460_s0] sm:$0xff]   ;;  %vm19_vm3 = vcmask 523264   ;;  %v1775_v8 = vmov 0.0  }
   0x2   :  { %v487_v3 = vsel %vm485_vm1, %v486_v2, 0  ;;  %v1807_v6 = vld [vmem:[%s2459_s1] sm:$0xff]   ;;  %1669 = vmatprep.mubr.msk.bf16.mxu0 %vm387_vm2, %v1741_v4  ;;  %22 = vst.msk [vmem:[#allocation2 + $0x10] sm:$0xff] %vm19_vm3, %v1775_v8  ;;  %20 = vst.msk [vmem:[#allocation2] sm:$0xff] %vm19_vm3, %v1775_v8  ;;  %v1743_v9 = vld [vmem:[%s2460_s0 + $0x8] sm:$0xff]   ;;  %vm1367_vm4 = vcmask 519168  }
   0x3   :  { %v1802_v5 = vand.u32 %v1739_v0, %v487_v3  ;;  %v1813_v7 = vld [vmem:[%s2460_s0 + $0x80] sm:$0xff]   ;;  %21 = vst.msk [vmem:[#allocation2 + $0x8] sm:$0xff] %vm19_vm3, %v1775_v8  ;;  %23 = vst.msk [vmem:[#allocation2 + $0x18] sm:$0xff] %vm19_vm3, %v1775_v8  ;;  %v1744_v10 = vld [vmem:[%s2460_s0 + $0x88] sm:$0xff]  }
   0x4   :  { %24 = vst.msk [vmem:[#allocation2 + $0x20] sm:$0xff] %vm19_vm3, %v1775_v8  ;;  %25 = vst.msk [vmem:[#allocation2 + $0x28] sm:$0xff] %vm19_vm3, %v1775_v8  ;;  %1701 = vmatprep.mubr.msk.bf16.mxu1 %vm387_vm2, %v1813_v7  ;;  %v1745_v11 = vld [vmem:[%s2460_s0 + $0x10] sm:$0xff]   ;;  %v1747_v13 = vld [vmem:[%s2460_s0 + $0x18] sm:$0xff]  }
   0x5   :  { %1665 = vmatprep.subr.bf16.mxu0 %v1802_v5  ;;  %1733 = vmatprep.subr.bf16.mxu1 %v1802_v5  ;;  %26 = vst.msk [vmem:[#allocation2 + $0x30] sm:$0xff] %vm19_vm3, %v1775_v8  ;;  %27 = vst.msk [vmem:[#allocation2 + $0x38] sm:$0xff] %vm19_vm3, %v1775_v8  ;;  %v1746_v12 = vld [vmem:[%s2460_s0 + $0x90] sm:$0xff]   ;;  %v1748_v14 = vld [vmem:[%s2460_s0 + $0x98] sm:$0xff]  }
   0x6   :  { %28 = vst.msk [vmem:[#allocation2 + $0x40] sm:$0xff] %vm19_vm3, %v1775_v8  ;;  %29 = vst.msk [vmem:[#allocation2 + $0x48] sm:$0xff] %vm19_vm3, %v1775_v8  ;;  %1666 = vmatpush3.bf16.msra.mxu0 %v1802_v5  ;;  %1735 = vmatpush3.bf16.msra.mxu1 %v1802_v5  ;;  %v1749_v15 = vld [vmem:[%s2460_s0 + $0x20] sm:$0xff]   ;;  %v1751_v17 = vld [vmem:[%s2460_s0 + $0x28] sm:$0xff]  }
   0x7   :  { %30 = vst.msk [vmem:[#allocation2 + $0x50] sm:$0xff] %vm19_vm3, %v1775_v8  ;;  %31 = vst.msk [vmem:[#allocation2 + $0x58] sm:$0xff] %vm19_vm3, %v1775_v8  ;;  %1667 = vmatprep.subr.bf16.mxu0 %v1807_v6  ;;  %1734 = vmatprep.subr.bf16.mxu1 %v1807_v6  ;;  %v1750_v16 = vld [vmem:[%s2460_s0 + $0xa0] sm:$0xff]   ;;  %v1752_v18 = vld [vmem:[%s2460_s0 + $0xa8] sm:$0xff]  }
   0x8   :  { %32 = vst.msk [vmem:[#allocation2 + $0x60] sm:$0xff] %vm19_vm3, %v1775_v8  ;;  %33 = vst.msk [vmem:[#allocation2 + $0x68] sm:$0xff] %vm19_vm3, %v1775_v8  ;;  %v1753_v19 = vld [vmem:[%s2460_s0 + $0x30] sm:$0xff]   ;;  %v1755_v21 = vld [vmem:[%s2460_s0 + $0x38] sm:$0xff]  }
   0x9   :  { %34 = vst.msk [vmem:[#allocation2 + $0x70] sm:$0xff] %vm19_vm3, %v1775_v8  ;;  %35 = vst.msk [vmem:[#allocation2 + $0x78] sm:$0xff] %vm19_vm3, %v1775_v8  ;;  %v1754_v20 = vld [vmem:[%s2460_s0 + $0xb0] sm:$0xff]   ;;  %v1756_v22 = vld [vmem:[%s2460_s0 + $0xb8] sm:$0xff]  }
   0xa   :  { %36 = vst.msk [vmem:[#allocation2 + $0x80] sm:$0xff] %vm19_vm3, %v1775_v8  ;;  %37 = vst.msk [vmem:[#allocation2 + $0x88] sm:$0xff] %vm19_vm3, %v1775_v8  ;;  %1668 = vmatpush3.bf16.msra.mxu0 %v1807_v6  ;;  %1736 = vmatpush3.bf16.msra.mxu1 %v1807_v6  ;;  %v1757_v23 = vld [vmem:[%s2460_s0 + $0x40] sm:$0xff]   ;;  %v1759_v25 = vld [vmem:[%s2460_s0 + $0x48] sm:$0xff]  }
   0xb   :  { %38 = vst.msk [vmem:[#allocation2 + $0x90] sm:$0xff] %vm19_vm3, %v1775_v8  ;;  %39 = vst.msk [vmem:[#allocation2 + $0x98] sm:$0xff] %vm19_vm3, %v1775_v8  ;;  %v1758_v24 = vld [vmem:[%s2460_s0 + $0xc0] sm:$0xff]   ;;  %v1760_v26 = vld [vmem:[%s2460_s0 + $0xc8] sm:$0xff]  }
   0xc   :  { %40 = vst.msk [vmem:[#allocation2 + $0xa0] sm:$0xff] %vm19_vm3, %v1775_v8  ;;  %41 = vst.msk [vmem:[#allocation2 + $0xa8] sm:$0xff] %vm19_vm3, %v1775_v8  ;;  %v1761_v27 = vld [vmem:[%s2460_s0 + $0x50] sm:$0xff]   ;;  %v1763_v29 = vld [vmem:[%s2460_s0 + $0x58] sm:$0xff]  }
   0xd   :  { %42 = vst.msk [vmem:[#allocation2 + $0xb0] sm:$0xff] %vm19_vm3, %v1775_v8  ;;  %43 = vst.msk [vmem:[#allocation2 + $0xb8] sm:$0xff] %vm19_vm3, %v1775_v8  ;;  %1670 = vmatmul.mubr.msk.bf16.vlgmr.msra.gmra.mxu0 %vm387_vm2, %v1743_v9  ;;  %1702 = vmatmul.mubr.msk.bf16.vlgmr.msra.gmra.mxu1 %vm387_vm2, %v1744_v10  ;;  %v1762_v28 = vld [vmem:[%s2460_s0 + $0xd0] sm:$0xff]   ;;  %v1764_v30 = vld [vmem:[%s2460_s0 + $0xd8] sm:$0xff]  }
   0xe   :  { %44 = vst.msk [vmem:[#allocation2 + $0xc0] sm:$0xff] %vm19_vm3, %v1775_v8  ;;  %45 = vst.msk [vmem:[#allocation2 + $0xc8] sm:$0xff] %vm19_vm3, %v1775_v8  ;;  %1673 = vmatprep.mubr.msk.bf16.mxu0 %vm387_vm2, %v1745_v11  ;;  %1705 = vmatprep.mubr.msk.bf16.mxu1 %vm387_vm2, %v1746_v12  ;;  %v1765_v31 = vld [vmem:[%s2460_s0 + $0x60] sm:$0xff]   ;;  %v1767_v33 = vld [vmem:[%s2460_s0 + $0x68] sm:$0xff]  }
   0xf   :  { %46 = vst.msk [vmem:[#allocation2 + $0xd0] sm:$0xff] %vm19_vm3, %v1775_v8  ;;  %47 = vst.msk [vmem:[#allocation2 + $0xd8] sm:$0xff] %vm19_vm3, %v1775_v8  ;;  %v1766_v32 = vld [vmem:[%s2460_s0 + $0xe0] sm:$0xff]   ;;  %v1768_v34 = vld [vmem:[%s2460_s0 + $0xe8] sm:$0xff]  }
  0x10   :  { %48 = vst.msk [vmem:[#allocation2 + $0xe0] sm:$0xff] %vm19_vm3, %v1775_v8  ;;  %49 = vst.msk [vmem:[#allocation2 + $0xe8] sm:$0xff] %vm19_vm3, %v1775_v8  ;;  %v1769_v35 = vld [vmem:[%s2460_s0 + $0x70] sm:$0xff]   ;;  %v1771_v37 = vld [vmem:[%s2460_s0 + $0x78] sm:$0xff]  }
  0x11   :  { %50 = vst.msk [vmem:[#allocation2 + $0xf0] sm:$0xff] %vm19_vm3, %v1775_v8  ;;  %51 = vst.msk [vmem:[#allocation2 + $0xf8] sm:$0xff] %vm19_vm3, %v1775_v8  ;;  %v1770_v36 = vld [vmem:[%s2460_s0 + $0xf0] sm:$0xff]   ;;  %v1772_v38 = vld [vmem:[%s2460_s0 + $0xf8] sm:$0xff]  }
  0x12   :  { %52 = vst.msk [vmem:[#allocation2 + $0x100] sm:$0xff] %vm19_vm3, %v1775_v8  ;;  %53 = vst.msk [vmem:[#allocation2 + $0x108] sm:$0xff] %vm19_vm3, %v1775_v8  ;;  %v86_v39 = vld [vmem:[#allocation2 + $0x10] sm:$0xff]  ;;  %v84_v43 = vld [vmem:[#allocation2] sm:$0xff] }
  0x13   :  { %54 = vst.msk [vmem:[#allocation2 + $0x110] sm:$0xff] %vm19_vm3, %v1775_v8  ;;  %55 = vst.msk [vmem:[#allocation2 + $0x118] sm:$0xff] %vm19_vm3, %v1775_v8  ;;  %v87_v49 = vld [vmem:[#allocation2 + $0x18] sm:$0xff]  ;;  %v85_v55 = vld [vmem:[#allocation2 + $0x8] sm:$0xff] }
  0x14   :  { %56 = vst.msk [vmem:[#allocation2 + $0x120] sm:$0xff] %vm19_vm3, %v1775_v8  ;;  %57 = vst.msk [vmem:[#allocation2 + $0x128] sm:$0xff] %vm19_vm3, %v1775_v8  ;;  %v90_v61 = vld [vmem:[#allocation2 + $0x30] sm:$0xff]  ;;  %v2082_v1 = vld [vmem:[%s2461_s2] ss:$0 sm:$0xff] }
  0x15   :  { %58 = vst.msk [vmem:[#allocation2 + $0x130] sm:$0xff] %vm19_vm3, %v1775_v8  ;;  %59 = vst.msk [vmem:[#allocation2 + $0x138] sm:$0xff] %vm19_vm3, %v1775_v8  ;;  %1674 = vmatmul.mubr.msk.bf16.gmra.mxu0 %vm387_vm2, %v1747_v13  ;;  %1706 = vmatmul.mubr.msk.bf16.gmra.mxu1 %vm387_vm2, %v1748_v14  ;;  %v88_v4 = vld [vmem:[#allocation2 + $0x20] sm:$0xff] }
  0x16   :  { %60 = vst.msk [vmem:[#allocation2 + $0x140] sm:$0xff] %vm19_vm3, %v1775_v8  ;;  %61 = vst.msk [vmem:[#allocation2 + $0x148] sm:$0xff] %vm19_vm3, %v1775_v8  ;;  %1677 = vmatprep.mubr.msk.bf16.mxu0 %vm387_vm2, %v1749_v15  ;;  %1709 = vmatprep.mubr.msk.bf16.mxu1 %vm387_vm2, %v1750_v16  ;;  %v91_v16 = vld [vmem:[#allocation2 + $0x38] sm:$0xff] }
  0x17   :  { %62 = vst.msk [vmem:[#allocation2 + $0x150] sm:$0xff] %vm19_vm3, %v1775_v8  ;;  %63 = vst.msk [vmem:[#allocation2 + $0x158] sm:$0xff] %vm19_vm3, %v1775_v8 }
  0x18   :  { %64 = vst.msk [vmem:[#allocation2 + $0x160] sm:$0xff] %vm19_vm3, %v1775_v8  ;;  %65 = vst.msk [vmem:[#allocation2 + $0x168] sm:$0xff] %vm19_vm3, %v1775_v8 }
  0x19   :  { %66 = vst.msk [vmem:[#allocation2 + $0x170] sm:$0xff] %vm19_vm3, %v1775_v8  ;;  %67 = vst.msk [vmem:[#allocation2 + $0x178] sm:$0xff] %vm19_vm3, %v1775_v8  ;;  %v116_v44 = vld [vmem:[#allocation2 + $0x100] sm:$0xff]  ;;  %v117_v56 = vld [vmem:[#allocation2 + $0x108] sm:$0xff] }
  0x1a   :  { %68 = vst.msk [vmem:[#allocation2 + $0x180] sm:$0xff] %vm19_vm3, %v1775_v8  ;;  %69 = vst.msk [vmem:[#allocation2 + $0x188] sm:$0xff] %vm19_vm3, %v1775_v8  ;;  %v118_v40 = vld [vmem:[#allocation2 + $0x110] sm:$0xff]  ;;  %v119_v50 = vld [vmem:[#allocation2 + $0x118] sm:$0xff] }
  0x1b   :  { %70 = vst.msk [vmem:[#allocation2 + $0x190] sm:$0xff] %vm19_vm3, %v1775_v8  ;;  %71 = vst.msk [vmem:[#allocation2 + $0x198] sm:$0xff] %vm19_vm3, %v1775_v8  ;;  %v120_v5 = vld [vmem:[#allocation2 + $0x120] sm:$0xff] }
  0x1c   :  { %72 = vst.msk [vmem:[#allocation2 + $0x1a0] sm:$0xff] %vm19_vm3, %v1775_v8  ;;  %73 = vst.msk [vmem:[#allocation2 + $0x1a8] sm:$0xff] %vm19_vm3, %v1775_v8  ;;  %v122_v62 = vld [vmem:[#allocation2 + $0x130] sm:$0xff] }
  0x1d   :  { %74 = vst.msk [vmem:[#allocation2 + $0x1b0] sm:$0xff] %vm19_vm3, %v1775_v8  ;;  %75 = vst.msk [vmem:[#allocation2 + $0x1b8] sm:$0xff] %vm19_vm3, %v1775_v8  ;;  %1678 = vmatmul.mubr.msk.bf16.gmra.mxu0 %vm387_vm2, %v1751_v17  ;;  %1710 = vmatmul.mubr.msk.bf16.gmra.mxu1 %vm387_vm2, %v1752_v18  ;;  %v123_v17 = vld [vmem:[#allocation2 + $0x138] sm:$0xff] }
  0x1e   :  { %76 = vst.msk [vmem:[#allocation2 + $0x1c0] sm:$0xff] %vm19_vm3, %v1775_v8  ;;  %77 = vst.msk [vmem:[#allocation2 + $0x1c8] sm:$0xff] %vm19_vm3, %v1775_v8  ;;  %1681 = vmatprep.mubr.msk.bf16.mxu0 %vm387_vm2, %v1753_v19  ;;  %1713 = vmatprep.mubr.msk.bf16.mxu1 %vm387_vm2, %v1754_v20 }
  0x1f   :  { %78 = vst.msk [vmem:[#allocation2 + $0x1d0] sm:$0xff] %vm19_vm3, %v1775_v8  ;;  %79 = vst.msk [vmem:[#allocation2 + $0x1d8] sm:$0xff] %vm19_vm3, %v1775_v8 }
  0x20   :  { %80 = vst.msk [vmem:[#allocation2 + $0x1e0] sm:$0xff] %vm19_vm3, %v1775_v8  ;;  %81 = vst.msk [vmem:[#allocation2 + $0x1e8] sm:$0xff] %vm19_vm3, %v1775_v8 }
  0x21   :  { %82 = vst.msk [vmem:[#allocation2 + $0x1f0] sm:$0xff] %vm19_vm3, %v1775_v8  ;;  %83 = vst.msk [vmem:[#allocation2 + $0x1f8] sm:$0xff] %vm19_vm3, %v1775_v8 }
  0x25   :  { %1682 = vmatmul.mubr.msk.bf16.gmra.mxu0 %vm387_vm2, %v1755_v21  ;;  %1714 = vmatmul.mubr.msk.bf16.gmra.mxu1 %vm387_vm2, %v1756_v22 }
  0x26   :  { %1685 = vmatprep.mubr.msk.bf16.mxu0 %vm387_vm2, %v1757_v23  ;;  %1717 = vmatprep.mubr.msk.bf16.mxu1 %vm387_vm2, %v1758_v24 }
  0x2d   :  { %1686 = vmatmul.mubr.msk.bf16.gmra.mxu0 %vm387_vm2, %v1759_v25  ;;  %1718 = vmatmul.mubr.msk.bf16.gmra.mxu1 %vm387_vm2, %v1760_v26  ;;  %v89_v26 = vld [vmem:[#allocation2 + $0x28] sm:$0xff] }
  0x2e   :  { %1689 = vmatprep.mubr.msk.bf16.mxu0 %vm387_vm2, %v1761_v27  ;;  %1721 = vmatprep.mubr.msk.bf16.mxu1 %vm387_vm2, %v1762_v28  ;;  %v121_v27 = vld [vmem:[#allocation2 + $0x128] sm:$0xff] }
  0x35   :  { %1690 = vmatmul.mubr.msk.bf16.gmra.mxu0 %vm387_vm2, %v1763_v29  ;;  %1722 = vmatmul.mubr.msk.bf16.gmra.mxu1 %vm387_vm2, %v1764_v30 }
  0x36   :  { %1693 = vmatprep.mubr.msk.bf16.mxu0 %vm387_vm2, %v1765_v31  ;;  %1725 = vmatprep.mubr.msk.bf16.mxu1 %vm387_vm2, %v1766_v32 }
  0x3d   :  { %1694 = vmatmul.mubr.msk.bf16.gmra.mxu0 %vm387_vm2, %v1767_v33  ;;  %1726 = vmatmul.mubr.msk.bf16.gmra.mxu1 %vm387_vm2, %v1768_v34 }
  0x3e   :  { %1697 = vmatprep.mubr.msk.bf16.mxu0 %vm387_vm2, %v1769_v35  ;;  %1729 = vmatprep.mubr.msk.bf16.mxu1 %vm387_vm2, %v1770_v36 }
  0x45   :  { %1698 = vmatmul.mubr.msk.bf16.gmra.mxu0 %vm387_vm2, %v1771_v37  ;;  %1730 = vmatmul.mubr.msk.bf16.gmra.mxu1 %vm387_vm2, %v1772_v38  ;;  %v94_v38 = vld [vmem:[#allocation2 + $0x50] sm:$0xff] }
  0xcd   :  { %v1671_v41 = vpop.f32.mrf.mxu0  ;;  %v1703_v42 = vpop.f32.mrf.mxu1 }
  0xce   :  { %v782_v45 = vadd.f32 %v1671_v41, %v86_v39  ;;  %v814_v46 = vadd.f32 %v1703_v42, %v118_v40  ;;  %v126_v39 = vld [vmem:[#allocation2 + $0x150] sm:$0xff] }
  0xcf   :  { %v525_v47 = vpop.f32.mrf.mxu0  ;;  %v653_v48 = vpop.f32.mrf.mxu1 }
  0xd0   :  { %847 = vst.msk [vmem:[#allocation2 + $0x10] sm:$0xff] %vm19_vm3, %v782_v45  ;;  %879 = vst.msk [vmem:[#allocation2 + $0x110] sm:$0xff] %vm19_vm3, %v814_v46  ;;  %v780_v51 = vadd.f32 %v525_v47, %v84_v43  ;;  %v812_v52 = vadd.f32 %v653_v48, %v116_v44 }
  0xd1   :  { %v1672_v53 = vpop.f32.mrf.mxu0  ;;  %v1704_v54 = vpop.f32.mrf.mxu1 }
  0xd2   :  { %845 = vst.msk [vmem:[#allocation2] sm:$0xff] %vm19_vm3, %v780_v51  ;;  %877 = vst.msk [vmem:[#allocation2 + $0x100] sm:$0xff] %vm19_vm3, %v812_v52  ;;  %v783_v57 = vadd.f32 %v1672_v53, %v87_v49  ;;  %v815_v58 = vadd.f32 %v1704_v54, %v119_v50  ;;  %v92_v52 = vld [vmem:[#allocation2 + $0x40] sm:$0xff] }
  0xd3   :  { %v528_v59 = vpop.f32.mrf.mxu0  ;;  %v656_v60 = vpop.f32.mrf.mxu1  ;;  %v124_v53 = vld [vmem:[#allocation2 + $0x140] sm:$0xff] }
  0xd4   :  { %848 = vst.msk [vmem:[#allocation2 + $0x18] sm:$0xff] %vm19_vm3, %v783_v57  ;;  %880 = vst.msk [vmem:[#allocation2 + $0x118] sm:$0xff] %vm19_vm3, %v815_v58  ;;  %v781_v63 = vadd.f32 %v528_v59, %v85_v55  ;;  %v813_v0 = vadd.f32 %v656_v60, %v117_v56 }
  0xd5   :  { %v1675_v2 = vpop.f32.mrf.mxu0  ;;  %v1707_v3 = vpop.f32.mrf.mxu1 }
  0xd6   :  { %846 = vst.msk [vmem:[#allocation2 + $0x8] sm:$0xff] %vm19_vm3, %v781_v63  ;;  %878 = vst.msk [vmem:[#allocation2 + $0x108] sm:$0xff] %vm19_vm3, %v813_v0  ;;  %v786_v6 = vadd.f32 %v1675_v2, %v90_v61  ;;  %v818_v7 = vadd.f32 %v1707_v3, %v122_v62  ;;  %v95_v3 = vld [vmem:[#allocation2 + $0x58] sm:$0xff] }
  0xd7   :  { %v914_v8 = vld [vmem:[#allocation2 + $0x10] sm:$0xff]  ;;  %v541_v10 = vpop.f32.mrf.mxu0  ;;  %v669_v11 = vpop.f32.mrf.mxu1 }
  0xd8   :  { %v946_v9 = vld [vmem:[#allocation2 + $0x110] sm:$0xff]  ;;  %v985_v12 = vadd.f32 %v2082_v1, %v914_v8  ;;  %851 = vst.msk [vmem:[#allocation2 + $0x30] sm:$0xff] %vm19_vm3, %v786_v6  ;;  %883 = vst.msk [vmem:[#allocation2 + $0x130] sm:$0xff] %vm19_vm3, %v818_v7  ;;  %v784_v14 = vadd.f32 %v541_v10, %v88_v4  ;;  %v816_v15 = vadd.f32 %v669_v11, %v120_v5  ;;  %v127_v4 = vld [vmem:[#allocation2 + $0x158] sm:$0xff] }
  0xd9   :  { %v1017_v13 = vadd.f32 %v2082_v1, %v946_v9  ;;  %v912_v18 = vld [vmem:[#allocation2] sm:$0xff]  ;;  %v1676_v20 = vpop.f32.mrf.mxu0  ;;  %v1708_v21 = vpop.f32.mrf.mxu1  ;;  %v93_v5 = vld [vmem:[#allocation2 + $0x48] sm:$0xff] }
  0xda   :  { %v944_v19 = vld [vmem:[#allocation2 + $0x100] sm:$0xff]  ;;  %v1049_v22 = vmax.f32 %v985_v12, 0.0  ;;  %v983_v24 = vadd.f32 %v2082_v1, %v912_v18  ;;  %849 = vst.msk [vmem:[#allocation2 + $0x20] sm:$0xff] %vm19_vm3, %v784_v14  ;;  %881 = vst.msk [vmem:[#allocation2 + $0x120] sm:$0xff] %vm19_vm3, %v816_v15  ;;  %v787_v30 = vadd.f32 %v1676_v20, %v91_v16  ;;  %v819_v31 = vadd.f32 %v1708_v21, %v123_v17  ;;  %v125_v14 = vld [vmem:[#allocation2 + $0x148] sm:$0xff] }
  0xdb   :  { %v1081_v23 = vmax.f32 %v1017_v13, 0.0  ;;  %v1015_v25 = vadd.f32 %v2082_v1, %v944_v19  ;;  %v915_v28 = vld [vmem:[#allocation2 + $0x18] sm:$0xff]  ;;  %v544_v32 = vpop.f32.mrf.mxu0  ;;  %v672_v33 = vpop.f32.mrf.mxu1 }
  0xdc   :  { %v947_v29 = vld [vmem:[#allocation2 + $0x118] sm:$0xff]  ;;  %v1569_v34 = vpack.c.bf16 %v1049_v22, %v1049_v22  ;;  %v1047_v36 = vmax.f32 %v983_v24, 0.0  ;;  %v986_v40 = vadd.f32 %v2082_v1, %v915_v28  ;;  %852 = vst.msk [vmem:[#allocation2 + $0x38] sm:$0xff] %vm19_vm3, %v787_v30  ;;  %884 = vst.msk [vmem:[#allocation2 + $0x138] sm:$0xff] %vm19_vm3, %v819_v31  ;;  %v785_v44 = vadd.f32 %v544_v32, %v89_v26  ;;  %v130_v26 = vld [vmem:[#allocation2 + $0x170] sm:$0xff] }
  0xdd   :  { %v1601_v35 = vpack.c.bf16 %v1081_v23, %v1081_v23  ;;  %v1079_v37 = vmax.f32 %v1015_v25, 0.0  ;;  %v1018_v41 = vadd.f32 %v2082_v1, %v947_v29  ;;  %v913_v42 = vld [vmem:[#allocation2 + $0x8] sm:$0xff]  ;;  %v817_v45 = vadd.f32 %v672_v33, %v121_v27  ;;  %v1679_v46 = vpop.f32.mrf.mxu0  ;;  %v1711_v47 = vpop.f32.mrf.mxu1  ;;  %v98_v25 = vld [vmem:[#allocation2 + $0x70] sm:$0xff] }
  0xde   :  { %v945_v43 = vld [vmem:[#allocation2 + $0x108] sm:$0xff]  ;;  %1370 = vst.msk [vmem:[%s2462_s3 + $0x8] sm:$0xf] %vm1367_vm4, %v1569_v34  ;;  %v1567_v48 = vpack.c.bf16 %v1047_v36, %v1047_v36  ;;  %v984_v50 = vadd.f32 %v2082_v1, %v913_v42  ;;  %v1050_v54 = vmax.f32 %v986_v40, 0.0  ;;  %v790_v58 = vadd.f32 %v1679_v46, %v94_v38  ;;  %v128_v40 = vld [vmem:[#allocation2 + $0x160] sm:$0xff] }
  0xdf   :  { %1402 = vst.msk [vmem:[%s2462_s3 + $0x88] sm:$0xf] %vm1367_vm4, %v1601_v35  ;;  %v1599_v49 = vpack.c.bf16 %v1079_v37, %v1079_v37  ;;  %v1016_v51 = vadd.f32 %v2082_v1, %v945_v43  ;;  %v1082_v55 = vmax.f32 %v1018_v41, 0.0  ;;  %v918_v56 = vld [vmem:[#allocation2 + $0x30] sm:$0xff]  ;;  %v822_v59 = vadd.f32 %v1711_v47, %v126_v39  ;;  %v557_v60 = vpop.f32.mrf.mxu0  ;;  %v685_v61 = vpop.f32.mrf.mxu1  ;;  %v96_v39 = vld [vmem:[#allocation2 + $0x60] sm:$0xff] }
  0xe0   :  { %v950_v57 = vld [vmem:[#allocation2 + $0x130] sm:$0xff]  ;;  %850 = vst.msk [vmem:[#allocation2 + $0x28] sm:$0xff] %vm19_vm3, %v785_v44  ;;  %882 = vst.msk [vmem:[#allocation2 + $0x128] sm:$0xff] %vm19_vm3, %v817_v45  ;;  %v1048_v62 = vmax.f32 %v984_v50, 0.0  ;;  %v989_v0 = vadd.f32 %v2082_v1, %v918_v56  ;;  %v1570_v6 = vpack.c.bf16 %v1050_v54, %v1050_v54  ;;  %v788_v10 = vadd.f32 %v557_v60, %v92_v52  ;;  %v131_v52 = vld [vmem:[#allocation2 + $0x178] sm:$0xff] }
  0xe1   :  { %1368 = vst.msk [vmem:[%s2462_s3] sm:$0xf] %vm1367_vm4, %v1567_v48  ;;  %1400 = vst.msk [vmem:[%s2462_s3 + $0x80] sm:$0xf] %vm1367_vm4, %v1599_v49  ;;  %v1080_v63 = vmax.f32 %v1016_v51, 0.0  ;;  %v1021_v2 = vadd.f32 %v2082_v1, %v950_v57  ;;  %v1602_v7 = vpack.c.bf16 %v1082_v55, %v1082_v55  ;;  %v916_v8 = vld [vmem:[#allocation2 + $0x20] sm:$0xff]  ;;  %v820_v11 = vadd.f32 %v685_v61, %v124_v53  ;;  %v1680_v12 = vpop.f32.mrf.mxu0  ;;  %v1712_v13 = vpop.f32.mrf.mxu1 }
  0xe2   :  { %v948_v9 = vld [vmem:[#allocation2 + $0x120] sm:$0xff]  ;;  %855 = vst.msk [vmem:[#allocation2 + $0x50] sm:$0xff] %vm19_vm3, %v790_v58  ;;  %887 = vst.msk [vmem:[#allocation2 + $0x150] sm:$0xff] %vm19_vm3, %v822_v59  ;;  %v1568_v15 = vpack.c.bf16 %v1048_v62, %v1048_v62  ;;  %v1053_v17 = vmax.f32 %v989_v0, 0.0  ;;  %v987_v19 = vadd.f32 %v2082_v1, %v916_v8  ;;  %v791_v21 = vadd.f32 %v1680_v12, %v95_v3  ;;  %v99_v51 = vld [vmem:[#allocation2 + $0x78] sm:$0xff] }
  0xe3   :  { %v1600_v16 = vpack.c.bf16 %v1080_v63, %v1080_v63  ;;  %v1085_v18 = vmax.f32 %v1021_v2, 0.0  ;;  %1371 = vst.msk [vmem:[%s2462_s3 + $0xc] sm:$0xf] %vm1367_vm4, %v1570_v6  ;;  %1403 = vst.msk [vmem:[%s2462_s3 + $0x8c] sm:$0xf] %vm1367_vm4, %v1602_v7  ;;  %v1019_v20 = vadd.f32 %v2082_v1, %v948_v9  ;;  %v823_v22 = vadd.f32 %v1712_v13, %v127_v4  ;;  %v560_v23 = vpop.f32.mrf.mxu0  ;;  %v688_v24 = vpop.f32.mrf.mxu1  ;;  %v919_v29 = vld [vmem:[#allocation2 + $0x38] sm:$0xff] }
  0xe4   :  { %853 = vst.msk [vmem:[#allocation2 + $0x40] sm:$0xff] %vm19_vm3, %v788_v10  ;;  %885 = vst.msk [vmem:[#allocation2 + $0x140] sm:$0xff] %vm19_vm3, %v820_v11  ;;  %v1573_v27 = vpack.c.bf16 %v1053_v17, %v1053_v17  ;;  %v951_v30 = vld [vmem:[#allocation2 + $0x138] sm:$0xff]  ;;  %v789_v31 = vadd.f32 %v560_v23, %v93_v5  ;;  %v821_v32 = vadd.f32 %v688_v24, %v125_v14  ;;  %v1051_v33 = vmax.f32 %v987_v19, 0.0  ;;  %v97_v2 = vld [vmem:[#allocation2 + $0x68] sm:$0xff] }
  0xe5   :  { %1369 = vst.msk [vmem:[%s2462_s3 + $0x4] sm:$0xf] %vm1367_vm4, %v1568_v15  ;;  %1401 = vst.msk [vmem:[%s2462_s3 + $0x84] sm:$0xf] %vm1367_vm4, %v1600_v16  ;;  %v1605_v28 = vpack.c.bf16 %v1085_v18, %v1085_v18  ;;  %v1083_v34 = vmax.f32 %v1019_v20, 0.0  ;;  %v990_v35 = vadd.f32 %v2082_v1, %v919_v29  ;;  %v1022_v36 = vadd.f32 %v2082_v1, %v951_v30  ;;  %v1683_v37 = vpop.f32.mrf.mxu0  ;;  %v1715_v38 = vpop.f32.mrf.mxu1  ;;  %v129_v3 = vld [vmem:[#allocation2 + $0x168] sm:$0xff] }
  0xe6   :  { %856 = vst.msk [vmem:[#allocation2 + $0x58] sm:$0xff] %vm19_vm3, %v791_v21  ;;  %888 = vst.msk [vmem:[#allocation2 + $0x158] sm:$0xff] %vm19_vm3, %v823_v22  ;;  %v794_v43 = vadd.f32 %v1683_v37, %v98_v25  ;;  %v826_v44 = vadd.f32 %v1715_v38, %v130_v26  ;;  %v1571_v45 = vpack.c.bf16 %v1051_v33, %v1051_v33  ;;  %v102_v16 = vld [vmem:[#allocation2 + $0x90] sm:$0xff]  ;;  %v132_v37 = vld [vmem:[#allocation2 + $0x180] sm:$0xff] }
  0xe7   :  { %1374 = vst.msk [vmem:[%s2462_s3 + $0x18] sm:$0xf] %vm1367_vm4, %v1573_v27  ;;  %1406 = vst.msk [vmem:[%s2462_s3 + $0x98] sm:$0xf] %vm1367_vm4, %v1605_v28  ;;  %v917_v41 = vld [vmem:[#allocation2 + $0x28] sm:$0xff]  ;;  %v1603_v46 = vpack.c.bf16 %v1083_v34, %v1083_v34  ;;  %v1054_v47 = vmax.f32 %v990_v35, 0.0  ;;  %v573_v49 = vpop.f32.mrf.mxu0  ;;  %v701_v50 = vpop.f32.mrf.mxu1 }
  0xe8   :  { %v949_v42 = vld [vmem:[#allocation2 + $0x128] sm:$0xff]  ;;  %854 = vst.msk [vmem:[#allocation2 + $0x48] sm:$0xff] %vm19_vm3, %v789_v31  ;;  %886 = vst.msk [vmem:[#allocation2 + $0x148] sm:$0xff] %vm19_vm3, %v821_v32  ;;  %v1086_v48 = vmax.f32 %v1022_v36, 0.0  ;;  %v988_v53 = vadd.f32 %v2082_v1, %v917_v41  ;;  %v792_v57 = vadd.f32 %v573_v49, %v96_v39  ;;  %v824_v58 = vadd.f32 %v701_v50, %v128_v40  ;;  %v134_v23 = vld [vmem:[#allocation2 + $0x190] sm:$0xff] }
  0xe9   :  { %v1020_v54 = vadd.f32 %v2082_v1, %v949_v42  ;;  %v922_v55 = vld [vmem:[#allocation2 + $0x50] sm:$0xff]  ;;  %859 = vst.msk [vmem:[#allocation2 + $0x70] sm:$0xff] %vm19_vm3, %v794_v43  ;;  %891 = vst.msk [vmem:[#allocation2 + $0x170] sm:$0xff] %vm19_vm3, %v826_v44  ;;  %v1574_v59 = vpack.c.bf16 %v1054_v47, %v1054_v47  ;;  %v1684_v63 = vpop.f32.mrf.mxu0  ;;  %v1716_v0 = vpop.f32.mrf.mxu1  ;;  %v100_v36 = vld [vmem:[#allocation2 + $0x80] sm:$0xff] }
  0xea   :  { %v954_v56 = vld [vmem:[#allocation2 + $0x150] sm:$0xff]  ;;  %1372 = vst.msk [vmem:[%s2462_s3 + $0x10] sm:$0xf] %vm1367_vm4, %v1571_v45  ;;  %1404 = vst.msk [vmem:[%s2462_s3 + $0x90] sm:$0xf] %vm1367_vm4, %v1603_v46  ;;  %v1606_v60 = vpack.c.bf16 %v1086_v48, %v1086_v48  ;;  %v993_v61 = vadd.f32 %v2082_v1, %v922_v55  ;;  %v1052_v4 = vmax.f32 %v988_v53, 0.0  ;;  %v795_v8 = vadd.f32 %v1684_v63, %v99_v51 }
  0xeb   :  { %v1025_v62 = vadd.f32 %v2082_v1, %v954_v56  ;;  %v1084_v5 = vmax.f32 %v1020_v54, 0.0  ;;  %v920_v6 = vld [vmem:[#allocation2 + $0x40] sm:$0xff]  ;;  %857 = vst.msk [vmem:[#allocation2 + $0x60] sm:$0xff] %vm19_vm3, %v792_v57  ;;  %889 = vst.msk [vmem:[#allocation2 + $0x160] sm:$0xff] %vm19_vm3, %v824_v58  ;;  %v827_v9 = vadd.f32 %v1716_v0, %v131_v52  ;;  %v576_v14 = vpop.f32.mrf.mxu0  ;;  %v704_v15 = vpop.f32.mrf.mxu1  ;;  %v103_v50 = vld [vmem:[#allocation2 + $0x98] sm:$0xff] }
  0xec   :  { %v952_v7 = vld [vmem:[#allocation2 + $0x140] sm:$0xff]  ;;  %1375 = vst.msk [vmem:[%s2462_s3 + $0x1c] sm:$0xf] %vm1367_vm4, %v1574_v59  ;;  %1407 = vst.msk [vmem:[%s2462_s3 + $0x9c] sm:$0xf] %vm1367_vm4, %v1606_v60  ;;  %v1057_v10 = vmax.f32 %v993_v61, 0.0  ;;  %v991_v12 = vadd.f32 %v2082_v1, %v920_v6  ;;  %v1572_v17 = vpack.c.bf16 %v1052_v4, %v1052_v4  ;;  %v793_v21 = vadd.f32 %v576_v14, %v97_v2 }
  0xed   :  { %v1089_v11 = vmax.f32 %v1025_v62, 0.0  ;;  %v1023_v13 = vadd.f32 %v2082_v1, %v952_v7  ;;  %v1604_v18 = vpack.c.bf16 %v1084_v5, %v1084_v5  ;;  %v923_v19 = vld [vmem:[#allocation2 + $0x58] sm:$0xff]  ;;  %860 = vst.msk [vmem:[#allocation2 + $0x78] sm:$0xff] %vm19_vm3, %v795_v8  ;;  %892 = vst.msk [vmem:[#allocation2 + $0x178] sm:$0xff] %vm19_vm3, %v827_v9  ;;  %v825_v22 = vadd.f32 %v704_v15, %v129_v3  ;;  %v1687_v30 = vpop.f32.mrf.mxu0  ;;  %v1719_v31 = vpop.f32.mrf.mxu1  ;;  %v133_v14 = vld [vmem:[#allocation2 + $0x188] sm:$0xff] }
  0xee   :  { %v955_v20 = vld [vmem:[#allocation2 + $0x158] sm:$0xff]  ;;  %v1577_v24 = vpack.c.bf16 %v1057_v10, %v1057_v10  ;;  %v1055_v26 = vmax.f32 %v991_v12, 0.0  ;;  %1373 = vst.msk [vmem:[%s2462_s3 + $0x14] sm:$0xf] %vm1367_vm4, %v1572_v17  ;;  %v994_v32 = vadd.f32 %v2082_v1, %v923_v19  ;;  %v798_v42 = vadd.f32 %v1687_v30, %v102_v16 }
  0xef   :  { %v1609_v25 = vpack.c.bf16 %v1089_v11, %v1089_v11  ;;  %v1087_v27 = vmax.f32 %v1023_v13, 0.0  ;;  %v921_v28 = vld [vmem:[#allocation2 + $0x48] sm:$0xff]  ;;  %1405 = vst.msk [vmem:[%s2462_s3 + $0x94] sm:$0xf] %vm1367_vm4, %v1604_v18  ;;  %v1026_v33 = vadd.f32 %v2082_v1, %v955_v20  ;;  %v830_v43 = vadd.f32 %v1719_v31, %v134_v23  ;;  %v589_v44 = vpop.f32.mrf.mxu0  ;;  %v717_v45 = vpop.f32.mrf.mxu1  ;;  %v135_v58 = vld [vmem:[#allocation2 + $0x198] sm:$0xff] }
  0xf0   :  { %v953_v29 = vld [vmem:[#allocation2 + $0x148] sm:$0xff]  ;;  %v992_v34 = vadd.f32 %v2082_v1, %v921_v28  ;;  %858 = vst.msk [vmem:[#allocation2 + $0x68] sm:$0xff] %vm19_vm3, %v793_v21  ;;  %890 = vst.msk [vmem:[#allocation2 + $0x168] sm:$0xff] %vm19_vm3, %v825_v22  ;;  %v1575_v38 = vpack.c.bf16 %v1055_v26, %v1055_v26  ;;  %v926_v40 = vld [vmem:[#allocation2 + $0x70] sm:$0xff]  ;;  %v1058_v46 = vmax.f32 %v994_v32, 0.0  ;;  %v796_v55 = vadd.f32 %v589_v44, %v100_v36 }
  0xf1   :  { %v1024_v35 = vadd.f32 %v2082_v1, %v953_v29  ;;  %1378 = vst.msk [vmem:[%s2462_s3 + $0x28] sm:$0xf] %vm1367_vm4, %v1577_v24  ;;  %1410 = vst.msk [vmem:[%s2462_s3 + $0xa8] sm:$0xf] %vm1367_vm4, %v1609_v25  ;;  %v1607_v39 = vpack.c.bf16 %v1087_v27, %v1087_v27  ;;  %v958_v41 = vld [vmem:[#allocation2 + $0x170] sm:$0xff]  ;;  %v1090_v47 = vmax.f32 %v1026_v33, 0.0  ;;  %v997_v51 = vadd.f32 %v2082_v1, %v926_v40  ;;  %v1688_v57 = vpop.f32.mrf.mxu0  ;;  %v1720_v59 = vpop.f32.mrf.mxu1 }
  0xf2   :  { %v1056_v48 = vmax.f32 %v992_v34, 0.0  ;;  %1376 = vst.msk [vmem:[%s2462_s3 + $0x20] sm:$0xf] %vm1367_vm4, %v1575_v38  ;;  %v1029_v52 = vadd.f32 %v2082_v1, %v958_v41  ;;  %v924_v53 = vld [vmem:[#allocation2 + $0x60] sm:$0xff]  ;;  %v828_v56 = vadd.f32 %v717_v45, %v132_v37  ;;  %v1578_v60 = vpack.c.bf16 %v1058_v46, %v1058_v46  ;;  %v101_v13 = vld [vmem:[#allocation2 + $0x88] sm:$0xff]  ;;  %v106_v27 = vld [vmem:[#allocation2 + $0xb0] sm:$0xff] }
  0xf3   :  { %v1088_v49 = vmax.f32 %v1024_v35, 0.0  ;;  %1408 = vst.msk [vmem:[%s2462_s3 + $0xa0] sm:$0xf] %vm1367_vm4, %v1607_v39  ;;  %v956_v54 = vld [vmem:[#allocation2 + $0x160] sm:$0xff]  ;;  %v1610_v61 = vpack.c.bf16 %v1090_v47, %v1090_v47  ;;  %v1061_v0 = vmax.f32 %v997_v51, 0.0  ;;  %v995_v3 = vadd.f32 %v2082_v1, %v924_v53  ;;  %v592_v7 = vpop.f32.mrf.mxu0  ;;  %v720_v8 = vpop.f32.mrf.mxu1  ;;  %v138_v28 = vld [vmem:[#allocation2 + $0x1b0] sm:$0xff] }
  0xf4   :  { %863 = vst.msk [vmem:[#allocation2 + $0x90] sm:$0xff] %vm19_vm3, %v798_v42  ;;  %895 = vst.msk [vmem:[#allocation2 + $0x190] sm:$0xff] %vm19_vm3, %v830_v43  ;;  %v1576_v62 = vpack.c.bf16 %v1056_v48, %v1056_v48  ;;  %v1093_v2 = vmax.f32 %v1029_v52, 0.0  ;;  %v1027_v4 = vadd.f32 %v2082_v1, %v956_v54  ;;  %v927_v5 = vld [vmem:[#allocation2 + $0x78] sm:$0xff]  ;;  %v799_v11 = vadd.f32 %v1688_v57, %v103_v50  ;;  %v104_v33 = vld [vmem:[#allocation2 + $0xa0] sm:$0xff] }
  0xf5   :  { %v1608_v63 = vpack.c.bf16 %v1088_v49, %v1088_v49  ;;  %v959_v6 = vld [vmem:[#allocation2 + $0x178] sm:$0xff]  ;;  %861 = vst.msk [vmem:[#allocation2 + $0x80] sm:$0xff] %vm19_vm3, %v796_v55  ;;  %893 = vst.msk [vmem:[#allocation2 + $0x180] sm:$0xff] %vm19_vm3, %v828_v56  ;;  %v998_v9 = vadd.f32 %v2082_v1, %v927_v5  ;;  %v831_v12 = vadd.f32 %v1720_v59, %v135_v58  ;;  %v1059_v17 = vmax.f32 %v995_v3, 0.0  ;;  %v1691_v21 = vpop.f32.mrf.mxu0  ;;  %v1723_v22 = vpop.f32.mrf.mxu1  ;;  %v136_v35 = vld [vmem:[#allocation2 + $0x1a0] sm:$0xff] }
  0xf6   :  { %1379 = vst.msk [vmem:[%s2462_s3 + $0x2c] sm:$0xf] %vm1367_vm4, %v1578_v60  ;;  %1411 = vst.msk [vmem:[%s2462_s3 + $0xac] sm:$0xf] %vm1367_vm4, %v1610_v61  ;;  %v1030_v10 = vadd.f32 %v2082_v1, %v959_v6  ;;  %v1581_v15 = vpack.c.bf16 %v1061_v0, %v1061_v0  ;;  %v1613_v16 = vpack.c.bf16 %v1093_v2, %v1093_v2  ;;  %v1091_v18 = vmax.f32 %v1027_v4, 0.0  ;;  %v107_v43 = vld [vmem:[#allocation2 + $0xb8] sm:$0xff] }
  0xf7   :  { %1377 = vst.msk [vmem:[%s2462_s3 + $0x24] sm:$0xf] %vm1367_vm4, %v1576_v62  ;;  %1409 = vst.msk [vmem:[%s2462_s3 + $0xa4] sm:$0xf] %vm1367_vm4, %v1608_v63  ;;  %v925_v19 = vld [vmem:[#allocation2 + $0x68] sm:$0xff]  ;;  %v1062_v23 = vmax.f32 %v998_v9, 0.0  ;;  %v1579_v29 = vpack.c.bf16 %v1059_v17, %v1059_v17  ;;  %v797_v31 = vadd.f32 %v592_v7, %v101_v13  ;;  %v829_v32 = vadd.f32 %v720_v8, %v133_v14  ;;  %v605_v34 = vpop.f32.mrf.mxu0  ;;  %v733_v36 = vpop.f32.mrf.mxu1 }
  0xf8   :  { %v957_v20 = vld [vmem:[#allocation2 + $0x168] sm:$0xff]  ;;  %v1094_v24 = vmax.f32 %v1030_v10, 0.0  ;;  %v996_v25 = vadd.f32 %v2082_v1, %v925_v19  ;;  %864 = vst.msk [vmem:[#allocation2 + $0x98] sm:$0xff] %vm19_vm3, %v799_v11  ;;  %896 = vst.msk [vmem:[#allocation2 + $0x198] sm:$0xff] %vm19_vm3, %v831_v12  ;;  %v1611_v30 = vpack.c.bf16 %v1091_v18, %v1091_v18  ;;  %v802_v46 = vadd.f32 %v1691_v21, %v106_v27  ;;  %v139_v49 = vld [vmem:[#allocation2 + $0x1b8] sm:$0xff] }
  0xf9   :  { %v1028_v26 = vadd.f32 %v2082_v1, %v957_v20  ;;  %1382 = vst.msk [vmem:[%s2462_s3 + $0x38] sm:$0xf] %vm1367_vm4, %v1581_v15  ;;  %1414 = vst.msk [vmem:[%s2462_s3 + $0xb8] sm:$0xf] %vm1367_vm4, %v1613_v16  ;;  %v1582_v37 = vpack.c.bf16 %v1062_v23, %v1062_v23  ;;  %v834_v47 = vadd.f32 %v1723_v22, %v138_v28  ;;  %v1692_v48 = vpop.f32.mrf.mxu0  ;;  %v1724_v50 = vpop.f32.mrf.mxu1  ;;  %v105_v51 = vld [vmem:[#allocation2 + $0xa8] sm:$0xff]  ;;  %v110_v2 = vld [vmem:[#allocation2 + $0xd0] sm:$0xff] }
  0xfa   :  { %v1614_v38 = vpack.c.bf16 %v1094_v24, %v1094_v24  ;;  %v1060_v39 = vmax.f32 %v996_v25, 0.0  ;;  %1380 = vst.msk [vmem:[%s2462_s3 + $0x30] sm:$0xf] %vm1367_vm4, %v1579_v29  ;;  %1412 = vst.msk [vmem:[%s2462_s3 + $0xb0] sm:$0xf] %vm1367_vm4, %v1611_v30  ;;  %v137_v52 = vld [vmem:[#allocation2 + $0x1a8] sm:$0xff]  ;;  %v800_v57 = vadd.f32 %v605_v34, %v104_v33  ;;  %v832_v58 = vadd.f32 %v733_v36, %v136_v35 }
  0xfb   :  { %v1092_v40 = vmax.f32 %v1028_v26, 0.0  ;;  %v930_v41 = vld [vmem:[#allocation2 + $0x90] sm:$0xff]  ;;  %862 = vst.msk [vmem:[#allocation2 + $0x88] sm:$0xff] %vm19_vm3, %v797_v31  ;;  %894 = vst.msk [vmem:[#allocation2 + $0x188] sm:$0xff] %vm19_vm3, %v829_v32  ;;  %v608_v63 = vpop.f32.mrf.mxu0  ;;  %v736_v0 = vpop.f32.mrf.mxu1  ;;  %v803_v4 = vadd.f32 %v1692_v48, %v107_v43  ;;  %v835_v5 = vadd.f32 %v1724_v50, %v139_v49  ;;  %v108_v8 = vld [vmem:[#allocation2 + $0xc0] sm:$0xff] }
  0xfc   :  { %v962_v42 = vld [vmem:[#allocation2 + $0x190] sm:$0xff]  ;;  %v1001_v44 = vadd.f32 %v2082_v1, %v930_v41  ;;  %1383 = vst.msk [vmem:[%s2462_s3 + $0x3c] sm:$0xf] %vm1367_vm4, %v1582_v37  ;;  %1415 = vst.msk [vmem:[%s2462_s3 + $0xbc] sm:$0xf] %vm1367_vm4, %v1614_v38  ;;  %v1580_v53 = vpack.c.bf16 %v1060_v39, %v1060_v39  ;;  %v928_v55 = vld [vmem:[#allocation2 + $0x80] sm:$0xff]  ;;  %v801_v6 = vadd.f32 %v608_v63, %v105_v51 }
  0xfd   :  { %v1033_v45 = vadd.f32 %v2082_v1, %v962_v42  ;;  %v1612_v54 = vpack.c.bf16 %v1092_v40, %v1092_v40  ;;  %v960_v56 = vld [vmem:[#allocation2 + $0x180] sm:$0xff]  ;;  %v999_v61 = vadd.f32 %v2082_v1, %v928_v55  ;;  %867 = vst.msk [vmem:[#allocation2 + $0xb0] sm:$0xff] %vm19_vm3, %v802_v46  ;;  %899 = vst.msk [vmem:[#allocation2 + $0x1b0] sm:$0xff] %vm19_vm3, %v834_v47  ;;  %v142_v3 = vld [vmem:[#allocation2 + $0x1d0] sm:$0xff]  ;;  %v1695_v15 = vpop.f32.mrf.mxu0  ;;  %v1727_v16 = vpop.f32.mrf.mxu1 }
  0xfe   :  { %v1065_v59 = vmax.f32 %v1001_v44, 0.0  ;;  %v1031_v62 = vadd.f32 %v2082_v1, %v960_v56  ;;  %1381 = vst.msk [vmem:[%s2462_s3 + $0x34] sm:$0xf] %vm1367_vm4, %v1580_v53  ;;  %v833_v7 = vadd.f32 %v736_v0, %v137_v52  ;;  %v140_v17 = vld [vmem:[#allocation2 + $0x1c0] sm:$0xff]  ;;  %v806_v20 = vadd.f32 %v1695_v15, %v110_v2  ;;  %v111_v26 = vld [vmem:[#allocation2 + $0xd8] sm:$0xff]  ;;  %v109_v38 = vld [vmem:[#allocation2 + $0xc8] sm:$0xff] }
  0xff   :  { %v1097_v60 = vmax.f32 %v1033_v45, 0.0  ;;  %1413 = vst.msk [vmem:[%s2462_s3 + $0xb4] sm:$0xf] %vm1367_vm4, %v1612_v54  ;;  %v1063_v11 = vmax.f32 %v999_v61, 0.0  ;;  %v931_v13 = vld [vmem:[#allocation2 + $0x98] sm:$0xff]  ;;  %v838_v21 = vadd.f32 %v1727_v16, %v142_v3  ;;  %v621_v24 = vpop.f32.mrf.mxu0  ;;  %v749_v25 = vpop.f32.mrf.mxu1  ;;  %v141_v39 = vld [vmem:[#allocation2 + $0x1c8] sm:$0xff] }
 0x100   :  { %865 = vst.msk [vmem:[#allocation2 + $0xa0] sm:$0xff] %vm19_vm3, %v800_v57  ;;  %897 = vst.msk [vmem:[#allocation2 + $0x1a0] sm:$0xff] %vm19_vm3, %v832_v58  ;;  %v1585_v9 = vpack.c.bf16 %v1065_v59, %v1065_v59  ;;  %v1095_v12 = vmax.f32 %v1031_v62, 0.0  ;;  %v963_v14 = vld [vmem:[#allocation2 + $0x198] sm:$0xff]  ;;  %v1002_v18 = vadd.f32 %v2082_v1, %v931_v13  ;;  %v804_v32 = vadd.f32 %v621_v24, %v108_v8 }
 0x101   :  { %v1617_v10 = vpack.c.bf16 %v1097_v60, %v1097_v60  ;;  %v1034_v19 = vadd.f32 %v2082_v1, %v963_v14  ;;  %868 = vst.msk [vmem:[#allocation2 + $0xb8] sm:$0xff] %vm19_vm3, %v803_v4  ;;  %900 = vst.msk [vmem:[#allocation2 + $0x1b8] sm:$0xff] %vm19_vm3, %v835_v5  ;;  %v1583_v22 = vpack.c.bf16 %v1063_v11, %v1063_v11  ;;  %v143_v27 = vld [vmem:[#allocation2 + $0x1d8] sm:$0xff]  ;;  %v1696_v36 = vpop.f32.mrf.mxu0  ;;  %v1728_v37 = vpop.f32.mrf.mxu1 }
 0x102   :  { %866 = vst.msk [vmem:[#allocation2 + $0xa8] sm:$0xff] %vm19_vm3, %v801_v6  ;;  %898 = vst.msk [vmem:[#allocation2 + $0x1a8] sm:$0xff] %vm19_vm3, %v833_v7  ;;  %v1615_v23 = vpack.c.bf16 %v1095_v12, %v1095_v12  ;;  %v1066_v28 = vmax.f32 %v1002_v18, 0.0  ;;  %v929_v30 = vld [vmem:[#allocation2 + $0x88] sm:$0xff]  ;;  %v836_v33 = vadd.f32 %v749_v25, %v140_v17  ;;  %v807_v44 = vadd.f32 %v1696_v36, %v111_v26 }
 0x103   :  { %1386 = vst.msk [vmem:[%s2462_s3 + $0x48] sm:$0xf] %vm1367_vm4, %v1585_v9  ;;  %1418 = vst.msk [vmem:[%s2462_s3 + $0xc8] sm:$0xf] %vm1367_vm4, %v1617_v10  ;;  %v1098_v29 = vmax.f32 %v1034_v19, 0.0  ;;  %v961_v31 = vld [vmem:[#allocation2 + $0x188] sm:$0xff]  ;;  %v1000_v34 = vadd.f32 %v2082_v1, %v929_v30  ;;  %v839_v45 = vadd.f32 %v1728_v37, %v143_v27  ;;  %v624_v52 = vpop.f32.mrf.mxu0  ;;  %v752_v53 = vpop.f32.mrf.mxu1 }
 0x104   :  { %871 = vst.msk [vmem:[#allocation2 + $0xd0] sm:$0xff] %vm19_vm3, %v806_v20  ;;  %903 = vst.msk [vmem:[#allocation2 + $0x1d0] sm:$0xff] %vm19_vm3, %v838_v21  ;;  %v1032_v35 = vadd.f32 %v2082_v1, %v961_v31  ;;  %v1586_v40 = vpack.c.bf16 %v1066_v28, %v1066_v28  ;;  %v934_v42 = vld [vmem:[#allocation2 + $0xb0] sm:$0xff]  ;;  %v805_v56 = vadd.f32 %v624_v52, %v109_v38 }
 0x105   :  { %1384 = vst.msk [vmem:[%s2462_s3 + $0x40] sm:$0xf] %vm1367_vm4, %v1583_v22  ;;  %1416 = vst.msk [vmem:[%s2462_s3 + $0xc0] sm:$0xf] %vm1367_vm4, %v1615_v23  ;;  %v1618_v41 = vpack.c.bf16 %v1098_v29, %v1098_v29  ;;  %v966_v43 = vld [vmem:[#allocation2 + $0x1b0] sm:$0xff]  ;;  %v1064_v46 = vmax.f32 %v1000_v34, 0.0  ;;  %v1005_v48 = vadd.f32 %v2082_v1, %v934_v42  ;;  %v837_v57 = vadd.f32 %v752_v53, %v141_v39  ;;  %v1699_v2 = vpop.f32.mrf.mxu0  ;;  %v1731_v3 = vpop.f32.mrf.mxu1 }
 0x106   :  { %869 = vst.msk [vmem:[#allocation2 + $0xc0] sm:$0xff] %vm19_vm3, %v804_v32  ;;  %901 = vst.msk [vmem:[#allocation2 + $0x1c0] sm:$0xff] %vm19_vm3, %v836_v33  ;;  %v1096_v47 = vmax.f32 %v1032_v35, 0.0  ;;  %v1037_v49 = vadd.f32 %v2082_v1, %v966_v43  ;;  %v114_v31 = vld [vmem:[#allocation2 + $0xf0] sm:$0xff] }
 0x107   :  { %v932_v50 = vld [vmem:[#allocation2 + $0xa0] sm:$0xff]  ;;  %1387 = vst.msk [vmem:[%s2462_s3 + $0x4c] sm:$0xf] %vm1367_vm4, %v1586_v40  ;;  %1419 = vst.msk [vmem:[%s2462_s3 + $0xcc] sm:$0xf] %vm1367_vm4, %v1618_v41  ;;  %v1584_v58 = vpack.c.bf16 %v1064_v46, %v1064_v46  ;;  %v1069_v60 = vmax.f32 %v1005_v48, 0.0  ;;  %v637_v15 = vpop.f32.mrf.mxu0  ;;  %v765_v16 = vpop.f32.mrf.mxu1  ;;  %v810_v52 = vadd.f32 %v1699_v2, %v114_v31 }
 0x108   :  { %v964_v51 = vld [vmem:[#allocation2 + $0x1a0] sm:$0xff]  ;;  %v1003_v54 = vadd.f32 %v2082_v1, %v932_v50  ;;  %872 = vst.msk [vmem:[#allocation2 + $0xd8] sm:$0xff] %vm19_vm3, %v807_v44  ;;  %904 = vst.msk [vmem:[#allocation2 + $0x1d8] sm:$0xff] %vm19_vm3, %v839_v45  ;;  %v1616_v59 = vpack.c.bf16 %v1096_v47, %v1096_v47  ;;  %v1101_v61 = vmax.f32 %v1037_v49, 0.0  ;;  %v935_v62 = vld [vmem:[#allocation2 + $0xb8] sm:$0xff] }
 0x109   :  { %v1035_v55 = vadd.f32 %v2082_v1, %v964_v51  ;;  %v967_v63 = vld [vmem:[#allocation2 + $0x1b8] sm:$0xff]  ;;  %v933_v0 = vld [vmem:[#allocation2 + $0xa8] sm:$0xff]  ;;  %v1006_v6 = vadd.f32 %v2082_v1, %v935_v62  ;;  %870 = vst.msk [vmem:[#allocation2 + $0xc8] sm:$0xff] %vm19_vm3, %v805_v56  ;;  %902 = vst.msk [vmem:[#allocation2 + $0x1c8] sm:$0xff] %vm19_vm3, %v837_v57  ;;  %v1589_v9 = vpack.c.bf16 %v1069_v60, %v1069_v60  ;;  %v1700_v33 = vpop.f32.mrf.mxu0  ;;  %v1732_v34 = vpop.f32.mrf.mxu1 }
 0x10a   :  { %v1067_v4 = vmax.f32 %v1003_v54, 0.0  ;;  %v1038_v7 = vadd.f32 %v2082_v1, %v967_v63  ;;  %v965_v8 = vld [vmem:[#allocation2 + $0x1a8] sm:$0xff]  ;;  %1385 = vst.msk [vmem:[%s2462_s3 + $0x44] sm:$0xf] %vm1367_vm4, %v1584_v58  ;;  %1417 = vst.msk [vmem:[%s2462_s3 + $0xc4] sm:$0xf] %vm1367_vm4, %v1616_v59  ;;  %v1621_v10 = vpack.c.bf16 %v1101_v61, %v1101_v61  ;;  %v1004_v11 = vadd.f32 %v2082_v1, %v933_v0 }
 0x10b   :  { %v1099_v5 = vmax.f32 %v1035_v55, 0.0  ;;  %v1036_v12 = vadd.f32 %v2082_v1, %v965_v8  ;;  %v938_v13 = vld [vmem:[#allocation2 + $0xd0] sm:$0xff]  ;;  %v1070_v19 = vmax.f32 %v1006_v6, 0.0  ;;  %1390 = vst.msk [vmem:[%s2462_s3 + $0x58] sm:$0xf] %vm1367_vm4, %v1589_v9  ;;  %v112_v45 = vld [vmem:[#allocation2 + $0xe0] sm:$0xff]  ;;  %v640_v60 = vpop.f32.mrf.mxu0  ;;  %v768_v62 = vpop.f32.mrf.mxu1 }
 0x10c   :  { %v970_v14 = vld [vmem:[#allocation2 + $0x1d0] sm:$0xff]  ;;  %v1587_v17 = vpack.c.bf16 %v1067_v4, %v1067_v4  ;;  %v1102_v20 = vmax.f32 %v1038_v7, 0.0  ;;  %1422 = vst.msk [vmem:[%s2462_s3 + $0xd8] sm:$0xf] %vm1367_vm4, %v1621_v10  ;;  %v1068_v21 = vmax.f32 %v1004_v11, 0.0  ;;  %v1009_v23 = vadd.f32 %v2082_v1, %v938_v13  ;;  %v144_v46 = vld [vmem:[#allocation2 + $0x1e0] sm:$0xff] }
 0x10d   :  { %v1619_v18 = vpack.c.bf16 %v1099_v5, %v1099_v5  ;;  %v1100_v22 = vmax.f32 %v1036_v12, 0.0  ;;  %v1041_v24 = vadd.f32 %v2082_v1, %v970_v14  ;;  %v936_v25 = vld [vmem:[#allocation2 + $0xc0] sm:$0xff]  ;;  %v1590_v27 = vpack.c.bf16 %v1070_v19, %v1070_v19  ;;  %v146_v32 = vld [vmem:[#allocation2 + $0x1f0] sm:$0xff]  ;;  %v115_v47 = vld [vmem:[#allocation2 + $0xf8] sm:$0xff]  ;;  %875 = vst.msk [vmem:[#allocation2 + $0xf0] sm:$0xff] %vm19_vm3, %v810_v52 }
 0x10e   :  { %v968_v26 = vld [vmem:[#allocation2 + $0x1c0] sm:$0xff]  ;;  %1388 = vst.msk [vmem:[%s2462_s3 + $0x50] sm:$0xf] %vm1367_vm4, %v1587_v17  ;;  %v1622_v28 = vpack.c.bf16 %v1102_v20, %v1102_v20  ;;  %v1007_v29 = vadd.f32 %v2082_v1, %v936_v25  ;;  %v1588_v35 = vpack.c.bf16 %v1068_v21, %v1068_v21  ;;  %v1073_v37 = vmax.f32 %v1009_v23, 0.0  ;;  %v147_v54 = vld [vmem:[#allocation2 + $0x1f8] sm:$0xff]  ;;  %v113_v59 = vld [vmem:[#allocation2 + $0xe8] sm:$0xff] }
 0x10f   :  { %1420 = vst.msk [vmem:[%s2462_s3 + $0xd0] sm:$0xf] %vm1367_vm4, %v1619_v18  ;;  %v1039_v30 = vadd.f32 %v2082_v1, %v968_v26  ;;  %v1620_v36 = vpack.c.bf16 %v1100_v22, %v1100_v22  ;;  %v1105_v38 = vmax.f32 %v1041_v24, 0.0  ;;  %v939_v39 = vld [vmem:[#allocation2 + $0xd8] sm:$0xff]  ;;  %1391 = vst.msk [vmem:[%s2462_s3 + $0x5c] sm:$0xf] %vm1367_vm4, %v1590_v27  ;;  %v842_v53 = vadd.f32 %v1731_v3, %v146_v32 }
 0x110   :  { %v971_v40 = vld [vmem:[#allocation2 + $0x1d8] sm:$0xff]  ;;  %1423 = vst.msk [vmem:[%s2462_s3 + $0xdc] sm:$0xf] %vm1367_vm4, %v1622_v28  ;;  %v1071_v41 = vmax.f32 %v1007_v29, 0.0  ;;  %v1010_v43 = vadd.f32 %v2082_v1, %v939_v39  ;;  %1389 = vst.msk [vmem:[%s2462_s3 + $0x54] sm:$0xf] %vm1367_vm4, %v1588_v35  ;;  %v1593_v48 = vpack.c.bf16 %v1073_v37, %v1073_v37  ;;  %v808_v2 = vadd.f32 %v637_v15, %v112_v45 }
 0x111   :  { %v1103_v42 = vmax.f32 %v1039_v30, 0.0  ;;  %v1042_v44 = vadd.f32 %v2082_v1, %v971_v40  ;;  %1421 = vst.msk [vmem:[%s2462_s3 + $0xd4] sm:$0xf] %vm1367_vm4, %v1620_v36  ;;  %v1625_v49 = vpack.c.bf16 %v1105_v38, %v1105_v38  ;;  %v937_v50 = vld [vmem:[#allocation2 + $0xc8] sm:$0xff]  ;;  %v840_v3 = vadd.f32 %v765_v16, %v144_v46  ;;  %v1773_v22 = vld [vmem:[%s2461_s2] ss:$0 sm:$0xff] }
 0x112   :  { %v969_v51 = vld [vmem:[#allocation2 + $0x1c8] sm:$0xff]  ;;  %v1591_v55 = vpack.c.bf16 %v1071_v41, %v1071_v41  ;;  %v1074_v57 = vmax.f32 %v1010_v43, 0.0  ;;  %1394 = vst.msk [vmem:[%s2462_s3 + $0x68] sm:$0xf] %vm1367_vm4, %v1593_v48  ;;  %v1008_v63 = vadd.f32 %v2082_v1, %v937_v50  ;;  %v811_v6 = vadd.f32 %v1700_v33, %v115_v47 }
 0x113   :  { %v1623_v56 = vpack.c.bf16 %v1103_v42, %v1103_v42  ;;  %v1106_v58 = vmax.f32 %v1042_v44, 0.0  ;;  %v145_v61 = vld [vmem:[#allocation2 + $0x1e8] sm:$0xff]  ;;  %1426 = vst.msk [vmem:[%s2462_s3 + $0xe8] sm:$0xf] %vm1367_vm4, %v1625_v49  ;;  %v1040_v0 = vadd.f32 %v2082_v1, %v969_v51  ;;  %v843_v7 = vadd.f32 %v1732_v34, %v147_v54 }
 0x114   :  { %907 = vst.msk [vmem:[#allocation2 + $0x1f0] sm:$0xff] %vm19_vm3, %v842_v53  ;;  %v1594_v4 = vpack.c.bf16 %v1074_v57, %v1074_v57  ;;  %v1072_v8 = vmax.f32 %v1008_v63, 0.0  ;;  %873 = vst.msk [vmem:[#allocation2 + $0xe0] sm:$0xff] %vm19_vm3, %v808_v2  ;;  %v809_v10 = vadd.f32 %v640_v60, %v113_v59  ;;  %v841_v11 = vadd.f32 %v768_v62, %v145_v61  ;;  %v942_v14 = vld [vmem:[#allocation2 + $0xf0] sm:$0xff] }
 0x115   :  { %1392 = vst.msk [vmem:[%s2462_s3 + $0x60] sm:$0xf] %vm1367_vm4, %v1591_v55  ;;  %1424 = vst.msk [vmem:[%s2462_s3 + $0xe0] sm:$0xf] %vm1367_vm4, %v1623_v56  ;;  %v1626_v5 = vpack.c.bf16 %v1106_v58, %v1106_v58  ;;  %v1104_v9 = vmax.f32 %v1040_v0, 0.0  ;;  %v1013_v16 = vadd.f32 %v2082_v1, %v942_v14 }
 0x116   :  { %905 = vst.msk [vmem:[#allocation2 + $0x1e0] sm:$0xff] %vm19_vm3, %v840_v3  ;;  %876 = vst.msk [vmem:[#allocation2 + $0xf8] sm:$0xff] %vm19_vm3, %v811_v6  ;;  %v1592_v12 = vpack.c.bf16 %v1072_v8, %v1072_v8 }
 0x117   :  { %1395 = vst.msk [vmem:[%s2462_s3 + $0x6c] sm:$0xf] %vm1367_vm4, %v1594_v4  ;;  %1427 = vst.msk [vmem:[%s2462_s3 + $0xec] sm:$0xf] %vm1367_vm4, %v1626_v5  ;;  %v1624_v13 = vpack.c.bf16 %v1104_v9, %v1104_v9  ;;  %v1077_v20 = vmax.f32 %v1013_v16, 0.0 }
 0x118   :  { %908 = vst.msk [vmem:[#allocation2 + $0x1f8] sm:$0xff] %vm19_vm3, %v843_v7  ;;  %874 = vst.msk [vmem:[#allocation2 + $0xe8] sm:$0xff] %vm19_vm3, %v809_v10 }
 0x119   :  { %906 = vst.msk [vmem:[#allocation2 + $0x1e8] sm:$0xff] %vm19_vm3, %v841_v11  ;;  %v1597_v31 = vpack.c.bf16 %v1077_v20, %v1077_v20 }
 0x11a   :  { %1393 = vst.msk [vmem:[%s2462_s3 + $0x64] sm:$0xf] %vm1367_vm4, %v1592_v12  ;;  %1425 = vst.msk [vmem:[%s2462_s3 + $0xe4] sm:$0xf] %vm1367_vm4, %v1624_v13 }
 0x11b   :  { %v974_v15 = vld [vmem:[#allocation2 + $0x1f0] sm:$0xff]  ;;  %v940_v18 = vld [vmem:[#allocation2 + $0xe0] sm:$0xff]  ;;  %1398 = vst.msk [vmem:[%s2462_s3 + $0x78] sm:$0xf] %vm1367_vm4, %v1597_v31 }
 0x11c   :  { %v1045_v17 = vadd.f32 %v2082_v1, %v974_v15  ;;  %v1011_v23 = vadd.f32 %v1773_v22, %v940_v18 }
 0x11d   :  { %v972_v19 = vld [vmem:[#allocation2 + $0x1e0] sm:$0xff]  ;;  %v943_v25 = vld [vmem:[#allocation2 + $0xf8] sm:$0xff] }
 0x11e   :  { %v1109_v21 = vmax.f32 %v1045_v17, 0.0  ;;  %v1043_v24 = vadd.f32 %v1773_v22, %v972_v19  ;;  %v1014_v27 = vadd.f32 %v1773_v22, %v943_v25  ;;  %v1075_v33 = vmax.f32 %v1011_v23, 0.0 }
 0x11f   :  { %v975_v26 = vld [vmem:[#allocation2 + $0x1f8] sm:$0xff]  ;;  %v941_v29 = vld [vmem:[#allocation2 + $0xe8] sm:$0xff] }
 0x120   :  { %v1046_v28 = vadd.f32 %v1773_v22, %v975_v26  ;;  %v973_v30 = vld [vmem:[#allocation2 + $0x1e8] sm:$0xff]  ;;  %v1629_v32 = vpack.c.bf16 %v1109_v21, %v1109_v21  ;;  %v1107_v1 = vmax.f32 %v1043_v24, 0.0  ;;  %v1078_v34 = vmax.f32 %v1014_v27, 0.0 }
 0x121   :  { %v1012_v36 = vadd.f32 %v1773_v22, %v941_v29  ;;  %v1044_v37 = vadd.f32 %v1773_v22, %v973_v30  ;;  %v1595_v38 = vpack.c.bf16 %v1075_v33, %v1075_v33 }
 0x122   :  { %v1110_v35 = vmax.f32 %v1046_v28, 0.0  ;;  %1430 = vst.msk [vmem:[%s2462_s3 + $0xf8] sm:$0xf] %vm1367_vm4, %v1629_v32  ;;  %v1627_v39 = vpack.c.bf16 %v1107_v1, %v1107_v1  ;;  %v1598_v40 = vpack.c.bf16 %v1078_v34, %v1078_v34 }
 0x123   :  { %v1076_v42 = vmax.f32 %v1012_v36, 0.0  ;;  %v1108_v43 = vmax.f32 %v1044_v37, 0.0  ;;  %1396 = vst.msk [vmem:[%s2462_s3 + $0x70] sm:$0xf] %vm1367_vm4, %v1595_v38 }
 0x124   :  { %v1630_v41 = vpack.c.bf16 %v1110_v35, %v1110_v35  ;;  %1428 = vst.msk [vmem:[%s2462_s3 + $0xf0] sm:$0xf] %vm1367_vm4, %v1627_v39  ;;  %1399 = vst.msk [vmem:[%s2462_s3 + $0x7c] sm:$0xf] %vm1367_vm4, %v1598_v40 }
 0x125   :  { %v1596_v44 = vpack.c.bf16 %v1076_v42, %v1076_v42  ;;  %v1628_v45 = vpack.c.bf16 %v1108_v43, %v1108_v43 }
 0x126   :  { %1431 = vst.msk [vmem:[%s2462_s3 + $0xfc] sm:$0xf] %vm1367_vm4, %v1630_v41 }
 0x127   :  { %1397 = vst.msk [vmem:[%s2462_s3 + $0x74] sm:$0xf] %vm1367_vm4, %v1596_v44  ;;  %1429 = vst.msk [vmem:[%s2462_s3 + $0xf4] sm:$0xf] %vm1367_vm4, %v1628_v45 }

</bundles_post_ra>
